<compile_context>
chip_gen: v7x
topology: tpu7x:2x2x1
jax: 0.10.0
libtpu: 0.0.40
codegen_flags: <defaults>
</compile_context>

<pallas_src>
import functools

import numpy as np
import jax
import jax.numpy as jnp
from jax import lax
from jax.experimental import pallas as pl
from jax.experimental.pallas import tpu as pltpu

LEAKY_SLOPE = 0.2
BN_EPS = 0.8          # nn.BatchNorm2d(out_filters, 0.8): 2nd positional arg is eps


def _layer_dims(channels, img_size):
    """(Cin, Cout, Hin, Win, has_bn) for the 4 discriminator blocks."""
    dims, h, cin = [], img_size, channels
    for cout, bn in ((16, False), (32, True), (64, True), (128, True)):
        dims.append((cin, cout, h, h, bn))
        cin = cout
        h = (h - 1) // 2 + 1                    # conv 3x3, stride 2, pad 1
    return dims


def _selection_and_weight_mats(w, hi, wi, ho, wo, tb):
    """Pack conv3x3/s2/p1 as: out = sum_ki (S[ki] @ A) @ M[ki] on (tb*H, W*C)."""
    cin, cout = w.shape[2], w.shape[3]
    S = np.zeros((3, ho, hi), np.float32)
    for ki in range(3):
        for i in range(ho):
            r = 2 * i + ki - 1
            if 0 <= r < hi:
                S[ki, i, r] = 1.0
    # block-diagonal over the tb images of one batch block
    S_blk = np.stack(
        [np.kron(np.eye(tb, dtype=np.float32), S[ki]) for ki in range(3)])
    M = np.zeros((3, wi * cin, wo * cout), np.float32)
    for ki in range(3):
        for kj in range(3):
            for j in range(wo):
                cj = 2 * j + kj - 1
                if 0 <= cj < wi:
                    M[ki, cj * cin:(cj + 1) * cin, j * cout:(j + 1) * cout] = w[ki, kj]
    return S_blk, M


def pack_base_params(params, channels, img_size, tb):
    """Host-side, one-time packing of conv / BN parameters into kernel matrices."""
    flat = []
    for (cin, cout, hi, wi, bn), p in zip(_layer_dims(channels, img_size), params):
        ho, wo = (hi - 1) // 2 + 1, (wi - 1) // 2 + 1
        S_blk, M = _selection_and_weight_mats(np.asarray(p["w"]), hi, wi, ho, wo, tb)
        bias = np.tile(np.asarray(p["b"]), wo).reshape(1, wo * cout)
        if bn:
            scale = np.asarray(p["gamma"]) / np.sqrt(np.asarray(p["var"]) + BN_EPS)
            shift = np.asarray(p["beta"]) - np.asarray(p["mean"]) * scale
        else:
            scale = np.ones((cout,), np.float32)
            shift = np.zeros((cout,), np.float32)
        scale = np.tile(scale, wo).reshape(1, wo * cout)
        shift = np.tile(shift, wo).reshape(1, wo * cout)
        flat += [jnp.asarray(S_blk), jnp.asarray(M),
                 jnp.asarray(bias), jnp.asarray(scale), jnp.asarray(shift)]
    return flat


def _base_kernel(x_ref, *refs):
    """One batch block: 4 x (conv -> LeakyReLU(0.2) -> Dropout(id) -> BN)."""
    out_ref = refs[-1]
    prm = refs[:-1]
    a = x_ref[...]                                       # (tb*H0, W0*C0), fp32
    for l in range(4):
        s_ref, m_ref, b_ref, sc_ref, sh_ref = prm[5 * l:5 * l + 5]
        z = b_ref[...]                                   # (1, Wo*Co), broadcasts
        for ki in range(3):                              # three kernel-row taps
            t = jnp.dot(s_ref[ki], a, preferred_element_type=jnp.float32)
            z = z + jnp.dot(t, m_ref[ki], preferred_element_type=jnp.float32)
        z = jnp.where(z > 0.0, z, LEAKY_SLOPE * z)       # LeakyReLU(0.2)
        # TODO(synk): Dropout2d(0.25) is inference-mode identity here.
        a = z * sc_ref[...] + sh_ref[...]                # eval BN (eps=0.8); id for block 1
    out_ref[...] = a                                     # (tb*H4, W4*128)


def base_forward(x_nchw, packed, channels, img_size, tb=8):
    b, c, h, w = x_nchw.shape
    dims = _layer_dims(channels, img_size)
    c_out = dims[-1][1]
    h_out = (dims[-1][2] - 1) // 2 + 1
    w_out = h_out
    bp = ((b + tb - 1) // tb) * tb

    # glue: NCHW -> per-image row-major (H, W*C); pad batch to a multiple of tb
    x_hwc = jnp.transpose(x_nchw.astype(jnp.float32), (0, 2, 3, 1))
    x_hwc = jnp.pad(x_hwc, ((0, bp - b), (0, 0), (0, 0), (0, 0)))
    x2d = x_hwc.reshape(bp * h, w * c)

    in_specs = [pl.BlockSpec((tb * h, w * c), lambda i: (i, 0))]
    for p in packed:
        in_specs.append(pl.BlockSpec(p.shape, lambda i, _n=p.ndim: (0,) * _n))

    out2d = pl.pallas_call(
        _base_kernel,
        out_shape=jax.ShapeDtypeStruct((bp * h_out, w_out * c_out), jnp.float32),
        grid_spec=pltpu.PrefetchScalarGridSpec(
            num_scalar_prefetch=0,
            grid=(bp // tb,),
            in_specs=in_specs,
            out_specs=pl.BlockSpec((tb * h_out, w_out * c_out), lambda i: (i, 0)),
        ),
        compiler_params=pltpu.CompilerParams(
            dimension_semantics=("parallel",),
            vmem_limit_bytes=64 * 1024 * 1024,
        ),
    )(x2d, *packed)

    # glue: back to PyTorch's channel-major flatten, drop batch padding
    out = out2d.reshape(bp, h_out, w_out, c_out)
    out = jnp.transpose(out, (0, 3, 1, 2)).reshape(bp, c_out * h_out * w_out)
    return out[:b]


def base_reference(x_nchw, params, channels, img_size):
    """Pure-JAX reference (lax conv) for correctness checking."""
    a = x_nchw.astype(jnp.float32)
    for (cin, cout, hi, wi, bn), p in zip(_layer_dims(channels, img_size), params):
        w_oihw = jnp.transpose(p["w"], (3, 2, 0, 1))
        a = lax.conv_general_dilated(
            a, w_oihw, window_strides=(2, 2), padding=((1, 1), (1, 1)),
            dimension_numbers=("NCHW", "OIHW", "NCHW"),
            precision=lax.Precision.HIGHEST)
        a = a + p["b"].reshape(1, -1, 1, 1)
        a = jnp.where(a > 0.0, a, LEAKY_SLOPE * a)
        if bn:
            scale = p["gamma"] / jnp.sqrt(p["var"] + BN_EPS)
            shift = p["beta"] - p["mean"] * scale
            a = a * scale.reshape(1, -1, 1, 1) + shift.reshape(1, -1, 1, 1)
    return a.reshape(a.shape[0], -1)


def init_base_params(key, channels, img_size):
    params = []
    for (cin, cout, hi, wi, bn) in _layer_dims(channels, img_size):
        key, kw, kb, kg, kbe, km, kv = jax.random.split(key, 7)
        p = {"w": 0.05 * jax.random.normal(kw, (3, 3, cin, cout), jnp.float32),
             "b": 0.05 * jax.random.normal(kb, (cout,), jnp.float32)}
        if bn:
            p["gamma"] = 1.0 + 0.1 * jax.random.normal(kg, (cout,), jnp.float32)
            p["beta"] = 0.1 * jax.random.normal(kbe, (cout,), jnp.float32)
            p["mean"] = 0.1 * jax.random.normal(km, (cout,), jnp.float32)
            p["var"] = 0.5 + jax.random.uniform(kv, (cout,), jnp.float32)
        params.append(p)
    return params


if __name__ == "__main__":
    B, C, H, W = 2, 4, 16, 16
    IMG = H
    TB = 8                                   # batch block (tunable; >= 8)

    key = jax.random.PRNGKey(0)
    kx, kp = jax.random.split(key)
    x = jax.random.normal(kx, (B, C, H, W), dtype=jnp.float32)
    params = init_base_params(kp, C, IMG)

    packed = pack_base_params(params, C, IMG, TB)
    fwd = jax.jit(functools.partial(base_forward, channels=C, img_size=IMG, tb=TB))

    out = fwd(x, packed)
    jax.block_until_ready(out)

    ds = IMG // 2 ** 4
    assert out.shape == (B, 128 * ds * ds)

    ref = base_reference(x, params, C, IMG)
    max_err = float(jnp.max(jnp.abs(out - ref)))
    assert max_err < 5e-3, f"mismatch vs lax.conv reference: {max_err}"

    print("KERNEL_OK")
</pallas_src>

<mosaic_0001>
module attributes {stable_mosaic.version = 11 : i64} {
  func.func @_base_kernel(%arg0: i32, %arg1: memref<128x64xf32, #tpu.memory_space<vmem>>, %arg2: memref<3x64x128xf32, #tpu.memory_space<vmem>>, %arg3: memref<3x64x128xf32, #tpu.memory_space<vmem>>, %arg4: memref<1x128xf32, #tpu.memory_space<vmem>>, %arg5: memref<1x128xf32, #tpu.memory_space<vmem>>, %arg6: memref<1x128xf32, #tpu.memory_space<vmem>>, %arg7: memref<3x32x64xf32, #tpu.memory_space<vmem>>, %arg8: memref<3x128x128xf32, #tpu.memory_space<vmem>>, %arg9: memref<1x128xf32, #tpu.memory_space<vmem>>, %arg10: memref<1x128xf32, #tpu.memory_space<vmem>>, %arg11: memref<1x128xf32, #tpu.memory_space<vmem>>, %arg12: memref<3x16x32xf32, #tpu.memory_space<vmem>>, %arg13: memref<3x128x128xf32, #tpu.memory_space<vmem>>, %arg14: memref<1x128xf32, #tpu.memory_space<vmem>>, %arg15: memref<1x128xf32, #tpu.memory_space<vmem>>, %arg16: memref<1x128xf32, #tpu.memory_space<vmem>>, %arg17: memref<3x8x16xf32, #tpu.memory_space<vmem>>, %arg18: memref<3x128x128xf32, #tpu.memory_space<vmem>>, %arg19: memref<1x128xf32, #tpu.memory_space<vmem>>, %arg20: memref<1x128xf32, #tpu.memory_space<vmem>>, %arg21: memref<1x128xf32, #tpu.memory_space<vmem>>, %arg22: memref<8x128xf32, #tpu.memory_space<vmem>>) attributes {dimension_semantics = [#tpu.dimension_semantics<parallel>], iteration_bounds = array<i64: 1>, scalar_prefetch = 0 : i64, scratch_operands = 0 : i64, tpu.core_type = #tpu.core_type<tc>, window_params = [{transform_indices = @transform_0, window_bounds = array<i64: 128, 64>}, {pipeline_mode = #tpu.pipeline_mode<synchronous>, transform_indices = @transform_1, window_bounds = array<i64: 3, 64, 128>}, {pipeline_mode = #tpu.pipeline_mode<synchronous>, transform_indices = @transform_2, window_bounds = array<i64: 3, 64, 128>}, {pipeline_mode = #tpu.pipeline_mode<synchronous>, transform_indices = @transform_3, window_bounds = array<i64: 1, 128>}, {pipeline_mode = #tpu.pipeline_mode<synchronous>, transform_indices = @transform_4, window_bounds = array<i64: 1, 128>}, {pipeline_mode = #tpu.pipeline_mode<synchronous>, transform_indices = @transform_5, window_bounds = array<i64: 1, 128>}, {pipeline_mode = #tpu.pipeline_mode<synchronous>, transform_indices = @transform_6, window_bounds = array<i64: 3, 32, 64>}, {pipeline_mode = #tpu.pipeline_mode<synchronous>, transform_indices = @transform_7, window_bounds = array<i64: 3, 128, 128>}, {pipeline_mode = #tpu.pipeline_mode<synchronous>, transform_indices = @transform_8, window_bounds = array<i64: 1, 128>}, {pipeline_mode = #tpu.pipeline_mode<synchronous>, transform_indices = @transform_9, window_bounds = array<i64: 1, 128>}, {pipeline_mode = #tpu.pipeline_mode<synchronous>, transform_indices = @transform_10, window_bounds = array<i64: 1, 128>}, {pipeline_mode = #tpu.pipeline_mode<synchronous>, transform_indices = @transform_11, window_bounds = array<i64: 3, 16, 32>}, {pipeline_mode = #tpu.pipeline_mode<synchronous>, transform_indices = @transform_12, window_bounds = array<i64: 3, 128, 128>}, {pipeline_mode = #tpu.pipeline_mode<synchronous>, transform_indices = @transform_13, window_bounds = array<i64: 1, 128>}, {pipeline_mode = #tpu.pipeline_mode<synchronous>, transform_indices = @transform_14, window_bounds = array<i64: 1, 128>}, {pipeline_mode = #tpu.pipeline_mode<synchronous>, transform_indices = @transform_15, window_bounds = array<i64: 1, 128>}, {pipeline_mode = #tpu.pipeline_mode<synchronous>, transform_indices = @transform_16, window_bounds = array<i64: 3, 8, 16>}, {pipeline_mode = #tpu.pipeline_mode<synchronous>, transform_indices = @transform_17, window_bounds = array<i64: 3, 128, 128>}, {pipeline_mode = #tpu.pipeline_mode<synchronous>, transform_indices = @transform_18, window_bounds = array<i64: 1, 128>}, {pipeline_mode = #tpu.pipeline_mode<synchronous>, transform_indices = @transform_19, window_bounds = array<i64: 1, 128>}, {pipeline_mode = #tpu.pipeline_mode<synchronous>, transform_indices = @transform_20, window_bounds = array<i64: 1, 128>}, {transform_indices = @transform_21, window_bounds = array<i64: 8, 128>}]} {
    %c0 = arith.constant 0 : index
    %c0_0 = arith.constant 0 : index
    %0 = vector.load %arg1[%c0, %c0_0] : memref<128x64xf32, #tpu.memory_space<vmem>>, vector<128x64xf32>
    %c0_1 = arith.constant 0 : index
    %c0_2 = arith.constant 0 : index
    %1 = vector.load %arg4[%c0_1, %c0_2] : memref<1x128xf32, #tpu.memory_space<vmem>>, vector<1x128xf32>
    %c0_3 = arith.constant 0 : index
    %c0_4 = arith.constant 0 : index
    %c0_5 = arith.constant 0 : index
    %2 = vector.load %arg2[%c0_3, %c0_4, %c0_5] : memref<3x64x128xf32, #tpu.memory_space<vmem>>, vector<1x64x128xf32>
    %3 = vector.shape_cast %2 : vector<1x64x128xf32> to vector<64x128xf32>
    %cst = arith.constant dense<0.000000e+00> : vector<64x64xf32>
    %4 = tpu.matmul %3, %0, %cst {dimension_numbers = #tpu.dot_dimension_numbers<[1], [0], [0], [1], [0, 0, 1, 1], [], []>} : vector<64x128xf32>, vector<128x64xf32>, vector<64x64xf32> -> vector<64x64xf32>
    %c0_6 = arith.constant 0 : index
    %c0_7 = arith.constant 0 : index
    %c0_8 = arith.constant 0 : index
    %5 = vector.load %arg3[%c0_6, %c0_7, %c0_8] : memref<3x64x128xf32, #tpu.memory_space<vmem>>, vector<1x64x128xf32>
    %6 = vector.shape_cast %5 : vector<1x64x128xf32> to vector<64x128xf32>
    %cst_9 = arith.constant dense<0.000000e+00> : vector<64x128xf32>
    %7 = tpu.matmul %4, %6, %cst_9 {dimension_numbers = #tpu.dot_dimension_numbers<[1], [0], [0], [1], [0, 0, 1, 1], [], []>} : vector<64x64xf32>, vector<64x128xf32>, vector<64x128xf32> -> vector<64x128xf32>
    %8 = vector.broadcast %1 : vector<1x128xf32> to vector<64x128xf32>
    %9 = arith.addf %8, %7 : vector<64x128xf32>
    %c1 = arith.constant 1 : index
    %c0_10 = arith.constant 0 : index
    %c0_11 = arith.constant 0 : index
    %10 = vector.load %arg2[%c1, %c0_10, %c0_11] : memref<3x64x128xf32, #tpu.memory_space<vmem>>, vector<1x64x128xf32>
    %11 = vector.shape_cast %10 : vector<1x64x128xf32> to vector<64x128xf32>
    %cst_12 = arith.constant dense<0.000000e+00> : vector<64x64xf32>
    %12 = tpu.matmul %11, %0, %cst_12 {dimension_numbers = #tpu.dot_dimension_numbers<[1], [0], [0], [1], [0, 0, 1, 1], [], []>} : vector<64x128xf32>, vector<128x64xf32>, vector<64x64xf32> -> vector<64x64xf32>
    %c1_13 = arith.constant 1 : index
    %c0_14 = arith.constant 0 : index
    %c0_15 = arith.constant 0 : index
    %13 = vector.load %arg3[%c1_13, %c0_14, %c0_15] : memref<3x64x128xf32, #tpu.memory_space<vmem>>, vector<1x64x128xf32>
    %14 = vector.shape_cast %13 : vector<1x64x128xf32> to vector<64x128xf32>
    %cst_16 = arith.constant dense<0.000000e+00> : vector<64x128xf32>
    %15 = tpu.matmul %12, %14, %cst_16 {dimension_numbers = #tpu.dot_dimension_numbers<[1], [0], [0], [1], [0, 0, 1, 1], [], []>} : vector<64x64xf32>, vector<64x128xf32>, vector<64x128xf32> -> vector<64x128xf32>
    %16 = arith.addf %9, %15 : vector<64x128xf32>
    %c2 = arith.constant 2 : index
    %c0_17 = arith.constant 0 : index
    %c0_18 = arith.constant 0 : index
    %17 = vector.load %arg2[%c2, %c0_17, %c0_18] : memref<3x64x128xf32, #tpu.memory_space<vmem>>, vector<1x64x128xf32>
    %18 = vector.shape_cast %17 : vector<1x64x128xf32> to vector<64x128xf32>
    %cst_19 = arith.constant dense<0.000000e+00> : vector<64x64xf32>
    %19 = tpu.matmul %18, %0, %cst_19 {dimension_numbers = #tpu.dot_dimension_numbers<[1], [0], [0], [1], [0, 0, 1, 1], [], []>} : vector<64x128xf32>, vector<128x64xf32>, vector<64x64xf32> -> vector<64x64xf32>
    %c2_20 = arith.constant 2 : index
    %c0_21 = arith.constant 0 : index
    %c0_22 = arith.constant 0 : index
    %20 = vector.load %arg3[%c2_20, %c0_21, %c0_22] : memref<3x64x128xf32, #tpu.memory_space<vmem>>, vector<1x64x128xf32>
    %21 = vector.shape_cast %20 : vector<1x64x128xf32> to vector<64x128xf32>
    %cst_23 = arith.constant dense<0.000000e+00> : vector<64x128xf32>
    %22 = tpu.matmul %19, %21, %cst_23 {dimension_numbers = #tpu.dot_dimension_numbers<[1], [0], [0], [1], [0, 0, 1, 1], [], []>} : vector<64x64xf32>, vector<64x128xf32>, vector<64x128xf32> -> vector<64x128xf32>
    %23 = arith.addf %16, %22 : vector<64x128xf32>
    %cst_24 = arith.constant 0.000000e+00 : f32
    %24 = vector.broadcast %cst_24 : f32 to vector<64x128xf32>
    %25 = arith.cmpf ogt, %23, %24 : vector<64x128xf32>
    %cst_25 = arith.constant 2.000000e-01 : f32
    %26 = vector.broadcast %cst_25 : f32 to vector<64x128xf32>
    %27 = arith.mulf %26, %23 : vector<64x128xf32>
    %28 = arith.select %25, %23, %27 : vector<64x128xi1>, vector<64x128xf32>
    %c0_26 = arith.constant 0 : index
    %c0_27 = arith.constant 0 : index
    %29 = vector.load %arg5[%c0_26, %c0_27] : memref<1x128xf32, #tpu.memory_space<vmem>>, vector<1x128xf32>
    %30 = vector.broadcast %29 : vector<1x128xf32> to vector<64x128xf32>
    %31 = arith.mulf %28, %30 : vector<64x128xf32>
    %c0_28 = arith.constant 0 : index
    %c0_29 = arith.constant 0 : index
    %32 = vector.load %arg6[%c0_28, %c0_29] : memref<1x128xf32, #tpu.memory_space<vmem>>, vector<1x128xf32>
    %33 = vector.broadcast %32 : vector<1x128xf32> to vector<64x128xf32>
    %34 = arith.addf %31, %33 : vector<64x128xf32>
    %c0_30 = arith.constant 0 : index
    %c0_31 = arith.constant 0 : index
    %35 = vector.load %arg9[%c0_30, %c0_31] : memref<1x128xf32, #tpu.memory_space<vmem>>, vector<1x128xf32>
    %c0_32 = arith.constant 0 : index
    %c0_33 = arith.constant 0 : index
    %c0_34 = arith.constant 0 : index
    %36 = vector.load %arg7[%c0_32, %c0_33, %c0_34] : memref<3x32x64xf32, #tpu.memory_space<vmem>>, vector<1x32x64xf32>
    %37 = vector.shape_cast %36 : vector<1x32x64xf32> to vector<32x64xf32>
    %cst_35 = arith.constant dense<0.000000e+00> : vector<32x128xf32>
    %38 = tpu.matmul %37, %34, %cst_35 {dimension_numbers = #tpu.dot_dimension_numbers<[1], [0], [0], [1], [0, 0, 1, 1], [], []>} : vector<32x64xf32>, vector<64x128xf32>, vector<32x128xf32> -> vector<32x128xf32>
    %c0_36 = arith.constant 0 : index
    %c0_37 = arith.constant 0 : index
    %c0_38 = arith.constant 0 : index
    %39 = vector.load %arg8[%c0_36, %c0_37, %c0_38] : memref<3x128x128xf32, #tpu.memory_space<vmem>>, vector<1x128x128xf32>
    %40 = vector.shape_cast %39 : vector<1x128x128xf32> to vector<128x128xf32>
    %cst_39 = arith.constant dense<0.000000e+00> : vector<32x128xf32>
    %41 = tpu.matmul %38, %40, %cst_39 {dimension_numbers = #tpu.dot_dimension_numbers<[1], [0], [0], [1], [0, 0, 1, 1], [], []>} : vector<32x128xf32>, vector<128x128xf32>, vector<32x128xf32> -> vector<32x128xf32>
    %42 = vector.broadcast %35 : vector<1x128xf32> to vector<32x128xf32>
    %43 = arith.addf %42, %41 : vector<32x128xf32>
    %c1_40 = arith.constant 1 : index
    %c0_41 = arith.constant 0 : index
    %c0_42 = arith.constant 0 : index
    %44 = vector.load %arg7[%c1_40, %c0_41, %c0_42] : memref<3x32x64xf32, #tpu.memory_space<vmem>>, vector<1x32x64xf32>
    %45 = vector.shape_cast %44 : vector<1x32x64xf32> to vector<32x64xf32>
    %cst_43 = arith.constant dense<0.000000e+00> : vector<32x128xf32>
    %46 = tpu.matmul %45, %34, %cst_43 {dimension_numbers = #tpu.dot_dimension_numbers<[1], [0], [0], [1], [0, 0, 1, 1], [], []>} : vector<32x64xf32>, vector<64x128xf32>, vector<32x128xf32> -> vector<32x128xf32>
    %c1_44 = arith.constant 1 : index
    %c0_45 = arith.constant 0 : index
    %c0_46 = arith.constant 0 : index
    %47 = vector.load %arg8[%c1_44, %c0_45, %c0_46] : memref<3x128x128xf32, #tpu.memory_space<vmem>>, vector<1x128x128xf32>
    %48 = vector.shape_cast %47 : vector<1x128x128xf32> to vector<128x128xf32>
    %cst_47 = arith.constant dense<0.000000e+00> : vector<32x128xf32>
    %49 = tpu.matmul %46, %48, %cst_47 {dimension_numbers = #tpu.dot_dimension_numbers<[1], [0], [0], [1], [0, 0, 1, 1], [], []>} : vector<32x128xf32>, vector<128x128xf32>, vector<32x128xf32> -> vector<32x128xf32>
    %50 = arith.addf %43, %49 : vector<32x128xf32>
    %c2_48 = arith.constant 2 : index
    %c0_49 = arith.constant 0 : index
    %c0_50 = arith.constant 0 : index
    %51 = vector.load %arg7[%c2_48, %c0_49, %c0_50] : memref<3x32x64xf32, #tpu.memory_space<vmem>>, vector<1x32x64xf32>
    %52 = vector.shape_cast %51 : vector<1x32x64xf32> to vector<32x64xf32>
    %cst_51 = arith.constant dense<0.000000e+00> : vector<32x128xf32>
    %53 = tpu.matmul %52, %34, %cst_51 {dimension_numbers = #tpu.dot_dimension_numbers<[1], [0], [0], [1], [0, 0, 1, 1], [], []>} : vector<32x64xf32>, vector<64x128xf32>, vector<32x128xf32> -> vector<32x128xf32>
    %c2_52 = arith.constant 2 : index
    %c0_53 = arith.constant 0 : index
    %c0_54 = arith.constant 0 : index
    %54 = vector.load %arg8[%c2_52, %c0_53, %c0_54] : memref<3x128x128xf32, #tpu.memory_space<vmem>>, vector<1x128x128xf32>
    %55 = vector.shape_cast %54 : vector<1x128x128xf32> to vector<128x128xf32>
    %cst_55 = arith.constant dense<0.000000e+00> : vector<32x128xf32>
    %56 = tpu.matmul %53, %55, %cst_55 {dimension_numbers = #tpu.dot_dimension_numbers<[1], [0], [0], [1], [0, 0, 1, 1], [], []>} : vector<32x128xf32>, vector<128x128xf32>, vector<32x128xf32> -> vector<32x128xf32>
    %57 = arith.addf %50, %56 : vector<32x128xf32>
    %cst_56 = arith.constant 0.000000e+00 : f32
    %58 = vector.broadcast %cst_56 : f32 to vector<32x128xf32>
    %59 = arith.cmpf ogt, %57, %58 : vector<32x128xf32>
    %cst_57 = arith.constant 2.000000e-01 : f32
    %60 = vector.broadcast %cst_57 : f32 to vector<32x128xf32>
    %61 = arith.mulf %60, %57 : vector<32x128xf32>
    %62 = arith.select %59, %57, %61 : vector<32x128xi1>, vector<32x128xf32>
    %c0_58 = arith.constant 0 : index
    %c0_59 = arith.constant 0 : index
    %63 = vector.load %arg10[%c0_58, %c0_59] : memref<1x128xf32, #tpu.memory_space<vmem>>, vector<1x128xf32>
    %64 = vector.broadcast %63 : vector<1x128xf32> to vector<32x128xf32>
    %65 = arith.mulf %62, %64 : vector<32x128xf32>
    %c0_60 = arith.constant 0 : index
    %c0_61 = arith.constant 0 : index
    %66 = vector.load %arg11[%c0_60, %c0_61] : memref<1x128xf32, #tpu.memory_space<vmem>>, vector<1x128xf32>
    %67 = vector.broadcast %66 : vector<1x128xf32> to vector<32x128xf32>
    %68 = arith.addf %65, %67 : vector<32x128xf32>
    %c0_62 = arith.constant 0 : index
    %c0_63 = arith.constant 0 : index
    %69 = vector.load %arg14[%c0_62, %c0_63] : memref<1x128xf32, #tpu.memory_space<vmem>>, vector<1x128xf32>
    %c0_64 = arith.constant 0 : index
    %c0_65 = arith.constant 0 : index
    %c0_66 = arith.constant 0 : index
    %70 = vector.load %arg12[%c0_64, %c0_65, %c0_66] : memref<3x16x32xf32, #tpu.memory_space<vmem>>, vector<1x16x32xf32>
    %71 = vector.shape_cast %70 : vector<1x16x32xf32> to vector<16x32xf32>
    %cst_67 = arith.constant dense<0.000000e+00> : vector<16x128xf32>
    %72 = tpu.matmul %71, %68, %cst_67 {dimension_numbers = #tpu.dot_dimension_numbers<[1], [0], [0], [1], [0, 0, 1, 1], [], []>} : vector<16x32xf32>, vector<32x128xf32>, vector<16x128xf32> -> vector<16x128xf32>
    %c0_68 = arith.constant 0 : index
    %c0_69 = arith.constant 0 : index
    %c0_70 = arith.constant 0 : index
    %73 = vector.load %arg13[%c0_68, %c0_69, %c0_70] : memref<3x128x128xf32, #tpu.memory_space<vmem>>, vector<1x128x128xf32>
    %74 = vector.shape_cast %73 : vector<1x128x128xf32> to vector<128x128xf32>
    %cst_71 = arith.constant dense<0.000000e+00> : vector<16x128xf32>
    %75 = tpu.matmul %72, %74, %cst_71 {dimension_numbers = #tpu.dot_dimension_numbers<[1], [0], [0], [1], [0, 0, 1, 1], [], []>} : vector<16x128xf32>, vector<128x128xf32>, vector<16x128xf32> -> vector<16x128xf32>
    %76 = vector.broadcast %69 : vector<1x128xf32> to vector<16x128xf32>
    %77 = arith.addf %76, %75 : vector<16x128xf32>
    %c1_72 = arith.constant 1 : index
    %c0_73 = arith.constant 0 : index
    %c0_74 = arith.constant 0 : index
    %78 = vector.load %arg12[%c1_72, %c0_73, %c0_74] : memref<3x16x32xf32, #tpu.memory_space<vmem>>, vector<1x16x32xf32>
    %79 = vector.shape_cast %78 : vector<1x16x32xf32> to vector<16x32xf32>
    %cst_75 = arith.constant dense<0.000000e+00> : vector<16x128xf32>
    %80 = tpu.matmul %79, %68, %cst_75 {dimension_numbers = #tpu.dot_dimension_numbers<[1], [0], [0], [1], [0, 0, 1, 1], [], []>} : vector<16x32xf32>, vector<32x128xf32>, vector<16x128xf32> -> vector<16x128xf32>
    %c1_76 = arith.constant 1 : index
    %c0_77 = arith.constant 0 : index
    %c0_78 = arith.constant 0 : index
    %81 = vector.load %arg13[%c1_76, %c0_77, %c0_78] : memref<3x128x128xf32, #tpu.memory_space<vmem>>, vector<1x128x128xf32>
    %82 = vector.shape_cast %81 : vector<1x128x128xf32> to vector<128x128xf32>
    %cst_79 = arith.constant dense<0.000000e+00> : vector<16x128xf32>
    %83 = tpu.matmul %80, %82, %cst_79 {dimension_numbers = #tpu.dot_dimension_numbers<[1], [0], [0], [1], [0, 0, 1, 1], [], []>} : vector<16x128xf32>, vector<128x128xf32>, vector<16x128xf32> -> vector<16x128xf32>
    %84 = arith.addf %77, %83 : vector<16x128xf32>
    %c2_80 = arith.constant 2 : index
    %c0_81 = arith.constant 0 : index
    %c0_82 = arith.constant 0 : index
    %85 = vector.load %arg12[%c2_80, %c0_81, %c0_82] : memref<3x16x32xf32, #tpu.memory_space<vmem>>, vector<1x16x32xf32>
    %86 = vector.shape_cast %85 : vector<1x16x32xf32> to vector<16x32xf32>
    %cst_83 = arith.constant dense<0.000000e+00> : vector<16x128xf32>
    %87 = tpu.matmul %86, %68, %cst_83 {dimension_numbers = #tpu.dot_dimension_numbers<[1], [0], [0], [1], [0, 0, 1, 1], [], []>} : vector<16x32xf32>, vector<32x128xf32>, vector<16x128xf32> -> vector<16x128xf32>
    %c2_84 = arith.constant 2 : index
    %c0_85 = arith.constant 0 : index
    %c0_86 = arith.constant 0 : index
    %88 = vector.load %arg13[%c2_84, %c0_85, %c0_86] : memref<3x128x128xf32, #tpu.memory_space<vmem>>, vector<1x128x128xf32>
    %89 = vector.shape_cast %88 : vector<1x128x128xf32> to vector<128x128xf32>
    %cst_87 = arith.constant dense<0.000000e+00> : vector<16x128xf32>
    %90 = tpu.matmul %87, %89, %cst_87 {dimension_numbers = #tpu.dot_dimension_numbers<[1], [0], [0], [1], [0, 0, 1, 1], [], []>} : vector<16x128xf32>, vector<128x128xf32>, vector<16x128xf32> -> vector<16x128xf32>
    %91 = arith.addf %84, %90 : vector<16x128xf32>
    %cst_88 = arith.constant 0.000000e+00 : f32
    %92 = vector.broadcast %cst_88 : f32 to vector<16x128xf32>
    %93 = arith.cmpf ogt, %91, %92 : vector<16x128xf32>
    %cst_89 = arith.constant 2.000000e-01 : f32
    %94 = vector.broadcast %cst_89 : f32 to vector<16x128xf32>
    %95 = arith.mulf %94, %91 : vector<16x128xf32>
    %96 = arith.select %93, %91, %95 : vector<16x128xi1>, vector<16x128xf32>
    %c0_90 = arith.constant 0 : index
    %c0_91 = arith.constant 0 : index
    %97 = vector.load %arg15[%c0_90, %c0_91] : memref<1x128xf32, #tpu.memory_space<vmem>>, vector<1x128xf32>
    %98 = vector.broadcast %97 : vector<1x128xf32> to vector<16x128xf32>
    %99 = arith.mulf %96, %98 : vector<16x128xf32>
    %c0_92 = arith.constant 0 : index
    %c0_93 = arith.constant 0 : index
    %100 = vector.load %arg16[%c0_92, %c0_93] : memref<1x128xf32, #tpu.memory_space<vmem>>, vector<1x128xf32>
    %101 = vector.broadcast %100 : vector<1x128xf32> to vector<16x128xf32>
    %102 = arith.addf %99, %101 : vector<16x128xf32>
    %c0_94 = arith.constant 0 : index
    %c0_95 = arith.constant 0 : index
    %103 = vector.load %arg19[%c0_94, %c0_95] : memref<1x128xf32, #tpu.memory_space<vmem>>, vector<1x128xf32>
    %c0_96 = arith.constant 0 : index
    %c0_97 = arith.constant 0 : index
    %c0_98 = arith.constant 0 : index
    %104 = vector.load %arg17[%c0_96, %c0_97, %c0_98] : memref<3x8x16xf32, #tpu.memory_space<vmem>>, vector<1x8x16xf32>
    %105 = vector.shape_cast %104 : vector<1x8x16xf32> to vector<8x16xf32>
    %cst_99 = arith.constant dense<0.000000e+00> : vector<8x128xf32>
    %106 = tpu.matmul %105, %102, %cst_99 {dimension_numbers = #tpu.dot_dimension_numbers<[1], [0], [0], [1], [0, 0, 1, 1], [], []>} : vector<8x16xf32>, vector<16x128xf32>, vector<8x128xf32> -> vector<8x128xf32>
    %c0_100 = arith.constant 0 : index
    %c0_101 = arith.constant 0 : index
    %c0_102 = arith.constant 0 : index
    %107 = vector.load %arg18[%c0_100, %c0_101, %c0_102] : memref<3x128x128xf32, #tpu.memory_space<vmem>>, vector<1x128x128xf32>
    %108 = vector.shape_cast %107 : vector<1x128x128xf32> to vector<128x128xf32>
    %cst_103 = arith.constant dense<0.000000e+00> : vector<8x128xf32>
    %109 = tpu.matmul %106, %108, %cst_103 {dimension_numbers = #tpu.dot_dimension_numbers<[1], [0], [0], [1], [0, 0, 1, 1], [], []>} : vector<8x128xf32>, vector<128x128xf32>, vector<8x128xf32> -> vector<8x128xf32>
    %110 = vector.broadcast %103 : vector<1x128xf32> to vector<8x128xf32>
    %111 = arith.addf %110, %109 : vector<8x128xf32>
    %c1_104 = arith.constant 1 : index
    %c0_105 = arith.constant 0 : index
    %c0_106 = arith.constant 0 : index
    %112 = vector.load %arg17[%c1_104, %c0_105, %c0_106] : memref<3x8x16xf32, #tpu.memory_space<vmem>>, vector<1x8x16xf32>
    %113 = vector.shape_cast %112 : vector<1x8x16xf32> to vector<8x16xf32>
    %cst_107 = arith.constant dense<0.000000e+00> : vector<8x128xf32>
    %114 = tpu.matmul %113, %102, %cst_107 {dimension_numbers = #tpu.dot_dimension_numbers<[1], [0], [0], [1], [0, 0, 1, 1], [], []>} : vector<8x16xf32>, vector<16x128xf32>, vector<8x128xf32> -> vector<8x128xf32>
    %c1_108 = arith.constant 1 : index
    %c0_109 = arith.constant 0 : index
    %c0_110 = arith.constant 0 : index
    %115 = vector.load %arg18[%c1_108, %c0_109, %c0_110] : memref<3x128x128xf32, #tpu.memory_space<vmem>>, vector<1x128x128xf32>
    %116 = vector.shape_cast %115 : vector<1x128x128xf32> to vector<128x128xf32>
    %cst_111 = arith.constant dense<0.000000e+00> : vector<8x128xf32>
    %117 = tpu.matmul %114, %116, %cst_111 {dimension_numbers = #tpu.dot_dimension_numbers<[1], [0], [0], [1], [0, 0, 1, 1], [], []>} : vector<8x128xf32>, vector<128x128xf32>, vector<8x128xf32> -> vector<8x128xf32>
    %118 = arith.addf %111, %117 : vector<8x128xf32>
    %c2_112 = arith.constant 2 : index
    %c0_113 = arith.constant 0 : index
    %c0_114 = arith.constant 0 : index
    %119 = vector.load %arg17[%c2_112, %c0_113, %c0_114] : memref<3x8x16xf32, #tpu.memory_space<vmem>>, vector<1x8x16xf32>
    %120 = vector.shape_cast %119 : vector<1x8x16xf32> to vector<8x16xf32>
    %cst_115 = arith.constant dense<0.000000e+00> : vector<8x128xf32>
    %121 = tpu.matmul %120, %102, %cst_115 {dimension_numbers = #tpu.dot_dimension_numbers<[1], [0], [0], [1], [0, 0, 1, 1], [], []>} : vector<8x16xf32>, vector<16x128xf32>, vector<8x128xf32> -> vector<8x128xf32>
    %c2_116 = arith.constant 2 : index
    %c0_117 = arith.constant 0 : index
    %c0_118 = arith.constant 0 : index
    %122 = vector.load %arg18[%c2_116, %c0_117, %c0_118] : memref<3x128x128xf32, #tpu.memory_space<vmem>>, vector<1x128x128xf32>
    %123 = vector.shape_cast %122 : vector<1x128x128xf32> to vector<128x128xf32>
    %cst_119 = arith.constant dense<0.000000e+00> : vector<8x128xf32>
    %124 = tpu.matmul %121, %123, %cst_119 {dimension_numbers = #tpu.dot_dimension_numbers<[1], [0], [0], [1], [0, 0, 1, 1], [], []>} : vector<8x128xf32>, vector<128x128xf32>, vector<8x128xf32> -> vector<8x128xf32>
    %125 = arith.addf %118, %124 : vector<8x128xf32>
    %cst_120 = arith.constant 0.000000e+00 : f32
    %126 = vector.broadcast %cst_120 : f32 to vector<8x128xf32>
    %127 = arith.cmpf ogt, %125, %126 : vector<8x128xf32>
    %cst_121 = arith.constant 2.000000e-01 : f32
    %128 = vector.broadcast %cst_121 : f32 to vector<8x128xf32>
    %129 = arith.mulf %128, %125 : vector<8x128xf32>
    %130 = arith.select %127, %125, %129 : vector<8x128xi1>, vector<8x128xf32>
    %c0_122 = arith.constant 0 : index
    %c0_123 = arith.constant 0 : index
    %131 = vector.load %arg20[%c0_122, %c0_123] : memref<1x128xf32, #tpu.memory_space<vmem>>, vector<1x128xf32>
    %132 = vector.broadcast %131 : vector<1x128xf32> to vector<8x128xf32>
    %133 = arith.mulf %130, %132 : vector<8x128xf32>
    %c0_124 = arith.constant 0 : index
    %c0_125 = arith.constant 0 : index
    %134 = vector.load %arg21[%c0_124, %c0_125] : memref<1x128xf32, #tpu.memory_space<vmem>>, vector<1x128xf32>
    %135 = vector.broadcast %134 : vector<1x128xf32> to vector<8x128xf32>
    %136 = arith.addf %133, %135 : vector<8x128xf32>
    %c0_126 = arith.constant 0 : index
    %c0_127 = arith.constant 0 : index
    %137 = vector.load %arg22[%c0_126, %c0_127] : memref<8x128xf32, #tpu.memory_space<vmem>>, vector<8x128xf32>
    tpu.vector_store %arg22[%c0_126, %c0_127], %136 {strides = array<i32>} : memref<8x128xf32, #tpu.memory_space<vmem>>, vector<8x128xf32>,
    return
  }
  func.func @transform_0(%arg0: i32) -> (i32, i32) {
    %c0_i32 = arith.constant 0 : i32
    %c0_i32_0 = arith.constant 0 : i32
    return %arg0, %c0_i32 : i32, i32
  }
  func.func @transform_1(%arg0: i32) -> (i32, i32, i32) {
    %c0_i32 = arith.constant 0 : i32
    %c0_i32_0 = arith.constant 0 : i32
    %c0_i32_1 = arith.constant 0 : i32
    %c0_i32_2 = arith.constant 0 : i32
    return %c0_i32, %c0_i32_0, %c0_i32_1 : i32, i32, i32
  }
  func.func @transform_2(%arg0: i32) -> (i32, i32, i32) {
    %c0_i32 = arith.constant 0 : i32
    %c0_i32_0 = arith.constant 0 : i32
    %c0_i32_1 = arith.constant 0 : i32
    %c0_i32_2 = arith.constant 0 : i32
    return %c0_i32, %c0_i32_0, %c0_i32_1 : i32, i32, i32
  }
  func.func @transform_3(%arg0: i32) -> (i32, i32) {
    %c0_i32 = arith.constant 0 : i32
    %c0_i32_0 = arith.constant 0 : i32
    %c0_i32_1 = arith.constant 0 : i32
    return %c0_i32, %c0_i32_0 : i32, i32
  }
  func.func @transform_4(%arg0: i32) -> (i32, i32) {
    %c0_i32 = arith.constant 0 : i32
    %c0_i32_0 = arith.constant 0 : i32
    %c0_i32_1 = arith.constant 0 : i32
    return %c0_i32, %c0_i32_0 : i32, i32
  }
  func.func @transform_5(%arg0: i32) -> (i32, i32) {
    %c0_i32 = arith.constant 0 : i32
    %c0_i32_0 = arith.constant 0 : i32
    %c0_i32_1 = arith.constant 0 : i32
    return %c0_i32, %c0_i32_0 : i32, i32
  }
  func.func @transform_6(%arg0: i32) -> (i32, i32, i32) {
    %c0_i32 = arith.constant 0 : i32
    %c0_i32_0 = arith.constant 0 : i32
    %c0_i32_1 = arith.constant 0 : i32
    %c0_i32_2 = arith.constant 0 : i32
    return %c0_i32, %c0_i32_0, %c0_i32_1 : i32, i32, i32
  }
  func.func @transform_7(%arg0: i32) -> (i32, i32, i32) {
    %c0_i32 = arith.constant 0 : i32
    %c0_i32_0 = arith.constant 0 : i32
    %c0_i32_1 = arith.constant 0 : i32
    %c0_i32_2 = arith.constant 0 : i32
    return %c0_i32, %c0_i32_0, %c0_i32_1 : i32, i32, i32
  }
  func.func @transform_8(%arg0: i32) -> (i32, i32) {
    %c0_i32 = arith.constant 0 : i32
    %c0_i32_0 = arith.constant 0 : i32
    %c0_i32_1 = arith.constant 0 : i32
    return %c0_i32, %c0_i32_0 : i32, i32
  }
  func.func @transform_9(%arg0: i32) -> (i32, i32) {
    %c0_i32 = arith.constant 0 : i32
    %c0_i32_0 = arith.constant 0 : i32
    %c0_i32_1 = arith.constant 0 : i32
    return %c0_i32, %c0_i32_0 : i32, i32
  }
  func.func @transform_10(%arg0: i32) -> (i32, i32) {
    %c0_i32 = arith.constant 0 : i32
    %c0_i32_0 = arith.constant 0 : i32
    %c0_i32_1 = arith.constant 0 : i32
    return %c0_i32, %c0_i32_0 : i32, i32
  }
  func.func @transform_11(%arg0: i32) -> (i32, i32, i32) {
    %c0_i32 = arith.constant 0 : i32
    %c0_i32_0 = arith.constant 0 : i32
    %c0_i32_1 = arith.constant 0 : i32
    %c0_i32_2 = arith.constant 0 : i32
    return %c0_i32, %c0_i32_0, %c0_i32_1 : i32, i32, i32
  }
  func.func @transform_12(%arg0: i32) -> (i32, i32, i32) {
    %c0_i32 = arith.constant 0 : i32
    %c0_i32_0 = arith.constant 0 : i32
    %c0_i32_1 = arith.constant 0 : i32
    %c0_i32_2 = arith.constant 0 : i32
    return %c0_i32, %c0_i32_0, %c0_i32_1 : i32, i32, i32
  }
  func.func @transform_13(%arg0: i32) -> (i32, i32) {
    %c0_i32 = arith.constant 0 : i32
    %c0_i32_0 = arith.constant 0 : i32
    %c0_i32_1 = arith.constant 0 : i32
    return %c0_i32, %c0_i32_0 : i32, i32
  }
  func.func @transform_14(%arg0: i32) -> (i32, i32) {
    %c0_i32 = arith.constant 0 : i32
    %c0_i32_0 = arith.constant 0 : i32
    %c0_i32_1 = arith.constant 0 : i32
    return %c0_i32, %c0_i32_0 : i32, i32
  }
  func.func @transform_15(%arg0: i32) -> (i32, i32) {
    %c0_i32 = arith.constant 0 : i32
    %c0_i32_0 = arith.constant 0 : i32
    %c0_i32_1 = arith.constant 0 : i32
    return %c0_i32, %c0_i32_0 : i32, i32
  }
  func.func @transform_16(%arg0: i32) -> (i32, i32, i32) {
    %c0_i32 = arith.constant 0 : i32
    %c0_i32_0 = arith.constant 0 : i32
    %c0_i32_1 = arith.constant 0 : i32
    %c0_i32_2 = arith.constant 0 : i32
    return %c0_i32, %c0_i32_0, %c0_i32_1 : i32, i32, i32
  }
  func.func @transform_17(%arg0: i32) -> (i32, i32, i32) {
    %c0_i32 = arith.constant 0 : i32
    %c0_i32_0 = arith.constant 0 : i32
    %c0_i32_1 = arith.constant 0 : i32
    %c0_i32_2 = arith.constant 0 : i32
    return %c0_i32, %c0_i32_0, %c0_i32_1 : i32, i32, i32
  }
  func.func @transform_18(%arg0: i32) -> (i32, i32) {
    %c0_i32 = arith.constant 0 : i32
    %c0_i32_0 = arith.constant 0 : i32
    %c0_i32_1 = arith.constant 0 : i32
    return %c0_i32, %c0_i32_0 : i32, i32
  }
  func.func @transform_19(%arg0: i32) -> (i32, i32) {
    %c0_i32 = arith.constant 0 : i32
    %c0_i32_0 = arith.constant 0 : i32
    %c0_i32_1 = arith.constant 0 : i32
    return %c0_i32, %c0_i32_0 : i32, i32
  }
  func.func @transform_20(%arg0: i32) -> (i32, i32) {
    %c0_i32 = arith.constant 0 : i32
    %c0_i32_0 = arith.constant 0 : i32
    %c0_i32_1 = arith.constant 0 : i32
    return %c0_i32, %c0_i32_0 : i32, i32
  }
  func.func @transform_21(%arg0: i32) -> (i32, i32) {
    %c0_i32 = arith.constant 0 : i32
    %c0_i32_0 = arith.constant 0 : i32
    return %arg0, %c0_i32 : i32, i32
  }
}

</mosaic_0001>

<bundles_post_ra>
// kernel: base_forward.1
= control target key start
LH: loop header
LB: loop body
LE: loop exit
PB: predicated region body
PF: predicated region fallthrough
CT: control target
= control target key end

     0   :  { %s5708_s0 = inlined_call_operand.hbm [shape: f32[128,64], index: 0, kind: input, shape index: {}]   ;;  %s5709_s1 = inlined_call_operand.hbm [shape: f32[3,64,128], index: 1, kind: input, shape index: {}]   ;;  %s5710_s2 = inlined_call_operand.hbm [shape: f32[3,64,128], index: 2, kind: input, shape index: {}]   ;;  %s5711_s3 = inlined_call_operand.hbm [shape: f32[1,128], index: 3, kind: input, shape index: {}]   ;;  %s5712_s4 = inlined_call_operand.hbm [shape: f32[1,128], index: 4, kind: input, shape index: {}]   ;;  %s5713_s5 = inlined_call_operand.hbm [shape: f32[1,128], index: 5, kind: input, shape index: {}]   ;;  %s5714_s6 = inlined_call_operand.hbm [shape: f32[3,32,64], index: 6, kind: input, shape index: {}]   ;;  %s5715_s7 = inlined_call_operand.hbm [shape: f32[3,128,128], index: 7, kind: input, shape index: {}]   ;;  %s5716_s8 = inlined_call_operand.hbm [shape: f32[1,128], index: 8, kind: input, shape index: {}]   ;;  %s5717_s9 = inlined_call_operand.hbm [shape: f32[1,128], index: 9, kind: input, shape index: {}]   ;;  %s5718_s10 = inlined_call_operand.hbm [shape: f32[1,128], index: 10, kind: input, shape index: {}]   ;;  %s5719_s11 = inlined_call_operand.hbm [shape: f32[3,16,32], index: 11, kind: input, shape index: {}]   ;;  %s5720_s12 = inlined_call_operand.hbm [shape: f32[3,128,128], index: 12, kind: input, shape index: {}]   ;;  %s5721_s13 = inlined_call_operand.hbm [shape: f32[1,128], index: 13, kind: input, shape index: {}]   ;;  %s5722_s14 = inlined_call_operand.hbm [shape: f32[1,128], index: 14, kind: input, shape index: {}]   ;;  %s5723_s15 = inlined_call_operand.hbm [shape: f32[1,128], index: 15, kind: input, shape index: {}]   ;;  %s5724_s16 = inlined_call_operand.hbm [shape: f32[3,8,16], index: 16, kind: input, shape index: {}]   ;;  %s5725_s17 = inlined_call_operand.hbm [shape: f32[3,128,128], index: 17, kind: input, shape index: {}]   ;;  %s5726_s18 = inlined_call_operand.hbm [shape: f32[1,128], index: 18, kind: input, shape index: {}]   ;;  %s5727_s19 = inlined_call_operand.hbm [shape: f32[1,128], index: 19, kind: input, shape index: {}]   ;;  %s5728_s20 = inlined_call_operand.hbm [shape: f32[1,128], index: 20, kind: input, shape index: {}]   ;;  %s5729_s21 = inlined_call_operand.hbm [shape: f32[8,128], index: 21, kind: output, shape index: {}]  }
   0x1   :  { %5741 = sst [smem:[#allocation48_spill]] %s5708_s0 }
   0x2   :  { %5742 = sst [smem:[#allocation49_spill]] %s5709_s1 }
   0x3   :  { %5743 = sst [smem:[#allocation50_spill]] %s5710_s2 }
   0x4   :  { %5744 = sst [smem:[#allocation51_spill]] %s5711_s3 }
   0x5   :  { %5745 = sst [smem:[#allocation52_spill]] %s5712_s4 }
   0x6   :  { %5746 = sst [smem:[#allocation53_spill]] %s5713_s5 }
   0x7   :  { %5747 = sst [smem:[#allocation54_spill]] %s5729_s21 }
   0x8   :  { %26 = vsyncpa [#allocation3], 0 }
   0x9   :  { %27 = vsyncpa [#allocation6], 0 }
   0xa   :  { %28 = vsyncpa [#allocation9], 0 }
   0xb   :  { %29 = vsyncpa [#allocation12], 0 }
   0xc   :  { %30 = vsyncpa [#allocation15], 0 }
   0xd   :  { %31 = vsyncpa [#allocation18], 0 }
   0xe   :  { %32 = vsyncpa [#allocation21], 0 }
   0xf   :  { %33 = vsyncpa [#allocation24], 0 }
  0x10   :  { %34 = vsyncpa [#allocation27], 0 }
  0x11   :  { %35 = vsyncpa [#allocation30], 0 }
  0x12   :  { %36 = vsyncpa [#allocation33], 0 }
  0x13   :  { %37 = vsyncpa [#allocation4], 0  ;;  %s5088_s2 = smov [#allocation5]   ;;  %s5089_s26 = smov [#allocation8]  }
  0x14   :  { %s55_s25 = sshll.u32 %s5088_s2, 4  ;;  %s80_s27 = sshll.u32 %s5089_s26, 4  ;;  %s56_s25 = int_to_ptr.vmem [resolvable:$true] %s55_s25  ;;  %s5225_s27 = int_to_ptr.vmem [resolvable:$true] %s80_s27 }
  0x15   :  { %s5748_s29 = sld [smem:[#allocation49_spill]] }
  0x1b   :  { %s4580_s0 = scalar_lea.hbm %s5748_s29, 3072 }
  0x1c   :  { %p4581_p0 = scmp.ne.s32.totalorder %s5748_s29, %s4580_s0  ;;  %p4584_p1 = scmp.lt.u32.totalorder %s4580_s0, %s5748_s29 }
  0x1e   :  { %p4586_p2 = pnand %p4584_p1, %p4581_p0 }
  0x20   :  { %4589 = shalt.err (!%p4586_p2)
}
  0x21   :  { %s4590_s23 = scalar_lea.vmem %s56_s25, 3072  ;;  %p4595_p4 = scmp.lt.s32.totalorder %s56_s25, %s56_s25 }
  0x22   :  { %p4591_p3 = scmp.ne.s32.totalorder %s56_s25, %s4590_s23  ;;  %p4596_p5 = scmp.lt.s32.totalorder %s4590_s23, %s4590_s23 }
  0x24   :  { %p4597_p6 = por %p4596_p5, %p4595_p4 }
  0x26   :  { %p4598_p7 = pnand %p4597_p6, %p4591_p3 }
  0x28   :  { %4601 = shalt.err (!%p4598_p7)
}
  0x29   :  { %s5736_s1 = smov 128   ;;  %s5738_s24 = smov 8  }
  0x2a   :  { %61 = dma.hbm_to_vmem [thread:$0]  %s5748_s29, 3072, %s56_s25, [#allocation6], %s5736_s1, %s5736_s1, %s5738_s24  }
  0x2b   :  { %s5749_s0 = sld [smem:[#allocation51_spill]] }
  0x31   :  { %s4602_s4 = scalar_lea.hbm %s5749_s0, 16 }
  0x32   :  { %p4603_p8 = scmp.ne.s32.totalorder %s5749_s0, %s4602_s4  ;;  %p4606_p9 = scmp.lt.u32.totalorder %s4602_s4, %s5749_s0 }
  0x34   :  { %p4608_p10 = pnand %p4606_p9, %p4603_p8 }
  0x36   :  { %4611 = shalt.err (!%p4608_p10)
}
  0x37   :  { %s4612_s2 = scalar_lea.vmem %s5225_s27, 16  ;;  %s4616_s25 = scalar_lea.vmem %s5225_s27, 32 }
  0x38   :  { %p4613_p11 = scmp.ne.s32.totalorder %s5225_s27, %s4612_s2  ;;  %p4617_p12 = scmp.lt.s32.totalorder %s5225_s27, %s5225_s27 }
  0x39   :  { %p4618_p13 = scmp.lt.s32.totalorder %s4616_s25, %s4612_s2 }
  0x3b   :  { %p4619_p0 = por %p4618_p13, %p4617_p12 }
  0x3d   :  { %p4620_p1 = pnand %p4619_p0, %p4613_p11 }
  0x3f   :  { %4623 = shalt.err (!%p4620_p1)
}
  0x40   :  { %83 = dma.hbm_to_vmem [thread:$0]  %s5749_s0, 16, %s5225_s27, [#allocation9]  }
  0x41   :  { %s5092_s3 = smov [#allocation11]   ;;  %s5093_s4 = smov [#allocation14]  }
  0x42   :  { %s100_s28 = sshll.u32 %s5092_s3, 4  ;;  %s121_s30 = sshll.u32 %s5093_s4, 4  ;;  %s101_s28 = int_to_ptr.vmem [resolvable:$true] %s100_s28  ;;  %s5260_s30 = int_to_ptr.vmem [resolvable:$true] %s121_s30 }
  0x43   :  { %s5750_s23 = sld [smem:[#allocation53_spill]] }
  0x49   :  { %s4624_s1 = scalar_lea.hbm %s5750_s23, 16 }
  0x4a   :  { %p4625_p2 = scmp.ne.s32.totalorder %s5750_s23, %s4624_s1  ;;  %p4628_p3 = scmp.lt.u32.totalorder %s4624_s1, %s5750_s23 }
  0x4c   :  { %p4630_p4 = pnand %p4628_p3, %p4625_p2 }
  0x4e   :  { %4633 = shalt.err (!%p4630_p4)
}
  0x4f   :  { %s4634_s27 = scalar_lea.vmem %s101_s28, 16  ;;  %s4638_s0 = scalar_lea.vmem %s101_s28, 32 }
  0x50   :  { %p4635_p5 = scmp.ne.s32.totalorder %s101_s28, %s4634_s27  ;;  %p4639_p6 = scmp.lt.s32.totalorder %s101_s28, %s101_s28 }
  0x51   :  { %p4640_p7 = scmp.lt.s32.totalorder %s4638_s0, %s4634_s27 }
  0x53   :  { %p4641_p8 = por %p4640_p7, %p4639_p6 }
  0x55   :  { %p4642_p9 = pnand %p4641_p8, %p4635_p5 }
  0x57   :  { %4645 = shalt.err (!%p4642_p9)
}
  0x58   :  { %103 = dma.hbm_to_vmem [thread:$0]  %s5750_s23, 16, %s101_s28, [#allocation12]  }
  0x59   :  { %s4646_s5 = scalar_lea.hbm %s5715_s7, 6144 }
  0x5a   :  { %p4647_p10 = scmp.ne.s32.totalorder %s5715_s7, %s4646_s5  ;;  %p4650_p11 = scmp.lt.u32.totalorder %s4646_s5, %s5715_s7 }
  0x5c   :  { %p4652_p12 = pnand %p4650_p11, %p4647_p10 }
  0x5e   :  { %4655 = shalt.err (!%p4652_p12)
}
  0x5f   :  { %s4656_s2 = scalar_lea.vmem %s5260_s30, 6144  ;;  %p4661_p0 = scmp.lt.s32.totalorder %s5260_s30, %s5260_s30 }
  0x60   :  { %p4657_p13 = scmp.ne.s32.totalorder %s5260_s30, %s4656_s2  ;;  %p4662_p1 = scmp.lt.s32.totalorder %s4656_s2, %s4656_s2 }
  0x62   :  { %p4663_p2 = por %p4662_p1, %p4661_p0 }
  0x64   :  { %p4664_p3 = pnand %p4663_p2, %p4657_p13 }
  0x66   :  { %4667 = shalt.err (!%p4664_p3)
}
  0x67   :  { %s5751_s28 = smov 8   ;;  %s5752_s23 = smov 128  }
  0x68   :  { %127 = dma.hbm_to_vmem [thread:$0]  %s5715_s7, 6144, %s5260_s30, [#allocation15], %s5752_s23, %s5752_s23, %s5751_s28  }
  0x69   :  { %s5094_s0 = smov [#allocation17]   ;;  %s5095_s26 = smov [#allocation20]  }
  0x6a   :  { %s144_s29 = sshll.u32 %s5094_s0, 4  ;;  %s163_s3 = sshll.u32 %s5095_s26, 4  ;;  %s145_s29 = int_to_ptr.vmem [resolvable:$true] %s144_s29  ;;  %s5294_s3 = int_to_ptr.vmem [resolvable:$true] %s163_s3 }
  0x6b   :  { %s4668_s21 = scalar_lea.hbm %s5717_s9, 16 }
  0x6c   :  { %p4669_p4 = scmp.ne.s32.totalorder %s5717_s9, %s4668_s21  ;;  %p4672_p5 = scmp.lt.u32.totalorder %s4668_s21, %s5717_s9 }
  0x6e   :  { %p4674_p6 = pnand %p4672_p5, %p4669_p4 }
  0x70   :  { %4677 = shalt.err (!%p4674_p6)
}
  0x71   :  { %s4678_s7 = scalar_lea.vmem %s145_s29, 16  ;;  %s4682_s30 = scalar_lea.vmem %s145_s29, 32 }
  0x72   :  { %p4679_p7 = scmp.ne.s32.totalorder %s145_s29, %s4678_s7  ;;  %p4683_p8 = scmp.lt.s32.totalorder %s145_s29, %s145_s29 }
  0x73   :  { %p4684_p9 = scmp.lt.s32.totalorder %s4682_s30, %s4678_s7 }
  0x75   :  { %p4685_p10 = por %p4684_p9, %p4683_p8 }
  0x77   :  { %p4686_p11 = pnand %p4685_p10, %p4679_p7 }
  0x79   :  { %4689 = shalt.err (!%p4686_p11)
}
  0x7a   :  { %147 = dma.hbm_to_vmem [thread:$0]  %s5717_s9, 16, %s145_s29, [#allocation18]  }
  0x7b   :  { %s4690_s4 = scalar_lea.hbm %s5719_s11, 768 }
  0x7c   :  { %p4691_p12 = scmp.ne.s32.totalorder %s5719_s11, %s4690_s4  ;;  %p4694_p13 = scmp.lt.u32.totalorder %s4690_s4, %s5719_s11 }
  0x7e   :  { %p4696_p0 = pnand %p4694_p13, %p4691_p12 }
  0x80   :  { %4699 = shalt.err (!%p4696_p0)
}
  0x81   :  { %s4700_s22 = scalar_lea.vmem %s5294_s3, 768  ;;  %p4705_p2 = scmp.lt.s32.totalorder %s5294_s3, %s5294_s3 }
  0x82   :  { %p4701_p1 = scmp.ne.s32.totalorder %s5294_s3, %s4700_s22  ;;  %p4706_p3 = scmp.lt.s32.totalorder %s4700_s22, %s4700_s22 }
  0x84   :  { %p4707_p4 = por %p4706_p3, %p4705_p2 }
  0x86   :  { %p4708_p5 = pnand %p4707_p4, %p4701_p1 }
  0x88   :  { %4711 = shalt.err (!%p4708_p5)
}
  0x89   :  { %169 = dma.hbm_to_vmem [thread:$0]  %s5719_s11, 768, %s5294_s3, [#allocation21], %s5752_s23, %s5752_s23, %s5751_s28  }
  0x8a   :  { %s5096_s2 = smov [#allocation23]   ;;  %s5097_s30 = smov [#allocation26]  }
  0x8b   :  { %s188_s7 = sshll.u32 %s5096_s2, 4  ;;  %s208_s25 = sshll.u32 %s5097_s30, 4  ;;  %s189_s7 = int_to_ptr.vmem [resolvable:$true] %s188_s7  ;;  %s209_s25 = int_to_ptr.vmem [resolvable:$true] %s208_s25 }
  0x8c   :  { %s4712_s26 = scalar_lea.hbm %s5721_s13, 16 }
  0x8d   :  { %p4713_p6 = scmp.ne.s32.totalorder %s5721_s13, %s4712_s26  ;;  %p4716_p7 = scmp.lt.u32.totalorder %s4712_s26, %s5721_s13 }
  0x8f   :  { %p4718_p8 = pnand %p4716_p7, %p4713_p6 }
  0x91   :  { %4721 = shalt.err (!%p4718_p8)
}
  0x92   :  { %s4722_s11 = scalar_lea.vmem %s189_s7, 16  ;;  %s4726_s3 = scalar_lea.vmem %s189_s7, 32 }
  0x93   :  { %p4723_p9 = scmp.ne.s32.totalorder %s189_s7, %s4722_s11  ;;  %p4727_p10 = scmp.lt.s32.totalorder %s189_s7, %s189_s7 }
  0x94   :  { %p4728_p11 = scmp.lt.s32.totalorder %s4726_s3, %s4722_s11 }
  0x96   :  { %p4729_p12 = por %p4728_p11, %p4727_p10 }
  0x98   :  { %p4730_p13 = pnand %p4729_p12, %p4723_p9 }
  0x9a   :  { %4733 = shalt.err (!%p4730_p13)
}
  0x9b   :  { %191 = dma.hbm_to_vmem [thread:$0]  %s5721_s13, 16, %s189_s7, [#allocation24]  }
  0x9c   :  { %s4734_s2 = scalar_lea.hbm %s5723_s15, 16 }
  0x9d   :  { %p4735_p0 = scmp.ne.s32.totalorder %s5723_s15, %s4734_s2  ;;  %p4738_p1 = scmp.lt.u32.totalorder %s4734_s2, %s5723_s15 }
  0x9f   :  { %p4740_p2 = pnand %p4738_p1, %p4735_p0 }
  0xa1   :  { %4743 = shalt.err (!%p4740_p2)
}
  0xa2   :  { %s4744_s4 = scalar_lea.vmem %s209_s25, 16  ;;  %s4748_s5 = scalar_lea.vmem %s209_s25, 32 }
  0xa3   :  { %p4745_p3 = scmp.ne.s32.totalorder %s209_s25, %s4744_s4  ;;  %p4749_p4 = scmp.lt.s32.totalorder %s209_s25, %s209_s25 }
  0xa4   :  { %p4750_p5 = scmp.lt.s32.totalorder %s4748_s5, %s4744_s4 }
  0xa6   :  { %p4751_p6 = por %p4750_p5, %p4749_p4 }
  0xa8   :  { %p4752_p7 = pnand %p4751_p6, %p4745_p3 }
  0xaa   :  { %4755 = shalt.err (!%p4752_p7)
}
  0xab   :  { %211 = dma.hbm_to_vmem [thread:$0]  %s5723_s15, 16, %s209_s25, [#allocation27]  }
  0xac   :  { %s5098_s21 = smov [#allocation29]   ;;  %s5099_s11 = smov [#allocation32]  }
  0xad   :  { %s229_s1 = sshll.u32 %s5098_s21, 4  ;;  %s252_s3 = sshll.u32 %s5099_s11, 4  ;;  %s230_s1 = int_to_ptr.vmem [resolvable:$true] %s229_s1  ;;  %s253_s3 = int_to_ptr.vmem [resolvable:$true] %s252_s3 }
  0xae   :  { %s4756_s9 = scalar_lea.hbm %s5725_s17, 6144 }
  0xaf   :  { %p4757_p8 = scmp.ne.s32.totalorder %s5725_s17, %s4756_s9  ;;  %p4760_p9 = scmp.lt.u32.totalorder %s4756_s9, %s5725_s17 }
  0xb1   :  { %p4762_p10 = pnand %p4760_p9, %p4757_p8 }
  0xb3   :  { %4765 = shalt.err (!%p4762_p10)
}
  0xb4   :  { %s4766_s15 = scalar_lea.vmem %s230_s1, 6144  ;;  %p4771_p12 = scmp.lt.s32.totalorder %s230_s1, %s230_s1 }
  0xb5   :  { %p4767_p11 = scmp.ne.s32.totalorder %s230_s1, %s4766_s15  ;;  %p4772_p13 = scmp.lt.s32.totalorder %s4766_s15, %s4766_s15 }
  0xb7   :  { %p4773_p0 = por %p4772_p13, %p4771_p12 }
  0xb9   :  { %p4774_p1 = pnand %p4773_p0, %p4767_p11 }
  0xbb   :  { %4777 = shalt.err (!%p4774_p1)
}
  0xbc   :  { %235 = dma.hbm_to_vmem [thread:$0]  %s5725_s17, 6144, %s230_s1, [#allocation30], %s5752_s23, %s5752_s23, %s5751_s28  }
  0xbd   :  { %s4778_s5 = scalar_lea.hbm %s5727_s19, 16 }
  0xbe   :  { %p4779_p2 = scmp.ne.s32.totalorder %s5727_s19, %s4778_s5  ;;  %p4782_p3 = scmp.lt.u32.totalorder %s4778_s5, %s5727_s19 }
  0xc0   :  { %p4784_p4 = pnand %p4782_p3, %p4779_p2 }
  0xc2   :  { %4787 = shalt.err (!%p4784_p4)
}
  0xc3   :  { %s4788_s24 = scalar_lea.vmem %s253_s3, 16  ;;  %s4792_s22 = scalar_lea.vmem %s253_s3, 32 }
  0xc4   :  { %p4789_p5 = scmp.ne.s32.totalorder %s253_s3, %s4788_s24  ;;  %p4793_p6 = scmp.lt.s32.totalorder %s253_s3, %s253_s3 }
  0xc5   :  { %p4794_p7 = scmp.lt.s32.totalorder %s4792_s22, %s4788_s24 }
  0xc7   :  { %p4795_p8 = por %p4794_p7, %p4793_p6 }
  0xc9   :  { %p4796_p9 = pnand %p4795_p8, %p4789_p5 }
  0xcb   :  { %4799 = shalt.err (!%p4796_p9)
}
  0xcc   :  { %255 = dma.hbm_to_vmem [thread:$0]  %s5727_s19, 16, %s253_s3, [#allocation33]  }
  0xcd   :  { %s5100_s9 = smov [#allocation2]   ;;  %s5101_s2 = smov [#allocation7]  }
  0xce   :  { %s43_s29 = sshll.u32 %s5100_s9, 4  ;;  %s67_s30 = sshll.u32 %s5101_s2, 4  ;;  %s44_s29 = int_to_ptr.vmem [resolvable:$true] %s43_s29  ;;  %s5379_s30 = int_to_ptr.vmem [resolvable:$true] %s67_s30 }
  0xcf   :  { %s5753_s25 = sld [smem:[#allocation48_spill]] }
  0xd5   :  { %s4800_s0 = scalar_lea.hbm %s5753_s25, 2048 }
  0xd6   :  { %p4801_p10 = scmp.ne.s32.totalorder %s5753_s25, %s4800_s0  ;;  %p4804_p11 = scmp.lt.u32.totalorder %s4800_s0, %s5753_s25 }
  0xd8   :  { %p4806_p12 = pnand %p4804_p11, %p4801_p10 }
  0xda   :  { %4809 = shalt.err (!%p4806_p12)
}
  0xdb   :  { %s4810_s19 = scalar_lea.vmem %s44_s29, 2048  ;;  %p4815_p0 = scmp.lt.s32.totalorder %s44_s29, %s44_s29 }
  0xdc   :  { %p4811_p13 = scmp.ne.s32.totalorder %s44_s29, %s4810_s19  ;;  %p4816_p1 = scmp.lt.s32.totalorder %s4810_s19, %s4810_s19 }
  0xde   :  { %p4817_p2 = por %p4816_p1, %p4815_p0 }
  0xe0   :  { %p4818_p3 = pnand %p4817_p2, %p4811_p13 }
  0xe2   :  { %4821 = shalt.err (!%p4818_p3)
}
  0xe3   :  { %49 = dma.hbm_to_vmem [thread:$0]  %s5753_s25, 2048, %s44_s29, [#allocation3], %s5752_s23, %s5752_s23, %s5751_s28  }
  0xe4   :  { %s5754_s24 = sld [smem:[#allocation50_spill]] }
  0xea   :  { %s4822_s22 = scalar_lea.hbm %s5754_s24, 3072 }
  0xeb   :  { %p4823_p4 = scmp.ne.s32.totalorder %s5754_s24, %s4822_s22  ;;  %p4826_p5 = scmp.lt.u32.totalorder %s4822_s22, %s5754_s24 }
  0xed   :  { %p4828_p6 = pnand %p4826_p5, %p4823_p4 }
  0xef   :  { %4831 = shalt.err (!%p4828_p6)
}
  0xf0   :  { %s4832_s27 = scalar_lea.vmem %s5379_s30, 3072  ;;  %p4837_p8 = scmp.lt.s32.totalorder %s5379_s30, %s5379_s30 }
  0xf1   :  { %p4833_p7 = scmp.ne.s32.totalorder %s5379_s30, %s4832_s27  ;;  %p4838_p9 = scmp.lt.s32.totalorder %s4832_s27, %s4832_s27 }
  0xf3   :  { %p4839_p10 = por %p4838_p9, %p4837_p8 }
  0xf5   :  { %p4840_p11 = pnand %p4839_p10, %p4833_p7 }
  0xf7   :  { %4843 = shalt.err (!%p4840_p11)
}
  0xf8   :  { %73 = dma.hbm_to_vmem [thread:$0]  %s5754_s24, 3072, %s5379_s30, [#allocation6], %s5752_s23, %s5752_s23, %s5751_s28  }
  0xf9   :  { %s5102_s25 = smov [#allocation10]   ;;  %s5103_s26 = smov [#allocation13]  }
  0xfa   :  { %s90_s0 = sshll.u32 %s5102_s25, 4  ;;  %s109_s4 = sshll.u32 %s5103_s26, 4  ;;  %s91_s0 = int_to_ptr.vmem [resolvable:$true] %s90_s0  ;;  %s5416_s4 = int_to_ptr.vmem [resolvable:$true] %s109_s4 }
  0xfb   :  { %s5755_s19 = sld [smem:[#allocation52_spill]] }
 0x101   :  { %s4844_s3 = scalar_lea.hbm %s5755_s19, 16 }
 0x102   :  { %p4845_p12 = scmp.ne.s32.totalorder %s5755_s19, %s4844_s3  ;;  %p4848_p13 = scmp.lt.u32.totalorder %s4844_s3, %s5755_s19 }
 0x104   :  { %p4850_p0 = pnand %p4848_p13, %p4845_p12 }
 0x106   :  { %4853 = shalt.err (!%p4850_p0)
}
 0x107   :  { %s4854_s30 = scalar_lea.vmem %s91_s0, 16  ;;  %s4858_s24 = scalar_lea.vmem %s91_s0, 32 }
 0x108   :  { %p4855_p1 = scmp.ne.s32.totalorder %s91_s0, %s4854_s30  ;;  %p4859_p2 = scmp.lt.s32.totalorder %s91_s0, %s91_s0 }
 0x109   :  { %p4860_p3 = scmp.lt.s32.totalorder %s4858_s24, %s4854_s30 }
 0x10b   :  { %p4861_p4 = por %p4860_p3, %p4859_p2 }
 0x10d   :  { %p4862_p5 = pnand %p4861_p4, %p4855_p1 }
 0x10f   :  { %4865 = shalt.err (!%p4862_p5)
}
 0x110   :  { %93 = dma.hbm_to_vmem [thread:$0]  %s5755_s19, 16, %s91_s0, [#allocation9]  }
 0x111   :  { %s4866_s27 = scalar_lea.hbm %s5714_s6, 1536 }
 0x112   :  { %p4867_p6 = scmp.ne.s32.totalorder %s5714_s6, %s4866_s27  ;;  %p4870_p7 = scmp.lt.u32.totalorder %s4866_s27, %s5714_s6 }
 0x114   :  { %p4872_p8 = pnand %p4870_p7, %p4867_p6 }
 0x116   :  { %4875 = shalt.err (!%p4872_p8)
}
 0x117   :  { %s4876_s5 = scalar_lea.vmem %s5416_s4, 1536  ;;  %p4881_p10 = scmp.lt.s32.totalorder %s5416_s4, %s5416_s4 }
 0x118   :  { %p4877_p9 = scmp.ne.s32.totalorder %s5416_s4, %s4876_s5  ;;  %p4882_p11 = scmp.lt.s32.totalorder %s4876_s5, %s4876_s5 }
 0x11a   :  { %p4883_p12 = por %p4882_p11, %p4881_p10 }
 0x11c   :  { %p4884_p13 = pnand %p4883_p12, %p4877_p9 }
 0x11e   :  { %4887 = shalt.err (!%p4884_p13)
}
 0x11f   :  { %115 = dma.hbm_to_vmem [thread:$0]  %s5714_s6, 1536, %s5416_s4, [#allocation12], %s5752_s23, %s5752_s23, %s5751_s28  }
 0x120   :  { %s5104_s19 = smov [#allocation16]   ;;  %s5105_s7 = smov [#allocation19]  }
 0x121   :  { %s134_s3 = sshll.u32 %s5104_s19, 4  ;;  %s154_s21 = sshll.u32 %s5105_s7, 4  ;;  %s135_s3 = int_to_ptr.vmem [resolvable:$true] %s134_s3  ;;  %s155_s21 = int_to_ptr.vmem [resolvable:$true] %s154_s21 }
 0x122   :  { %s4888_s30 = scalar_lea.hbm %s5716_s8, 16 }
 0x123   :  { %p4889_p0 = scmp.ne.s32.totalorder %s5716_s8, %s4888_s30  ;;  %p4892_p1 = scmp.lt.u32.totalorder %s4888_s30, %s5716_s8 }
 0x125   :  { %p4894_p2 = pnand %p4892_p1, %p4889_p0 }
 0x127   :  { %4897 = shalt.err (!%p4894_p2)
}
 0x128   :  { %s4898_s6 = scalar_lea.vmem %s135_s3, 16  ;;  %s4902_s4 = scalar_lea.vmem %s135_s3, 32 }
 0x129   :  { %p4899_p3 = scmp.ne.s32.totalorder %s135_s3, %s4898_s6  ;;  %p4903_p4 = scmp.lt.s32.totalorder %s135_s3, %s135_s3 }
 0x12a   :  { %p4904_p5 = scmp.lt.s32.totalorder %s4902_s4, %s4898_s6 }
 0x12c   :  { %p4905_p6 = por %p4904_p5, %p4903_p4 }
 0x12e   :  { %p4906_p7 = pnand %p4905_p6, %p4899_p3 }
 0x130   :  { %4909 = shalt.err (!%p4906_p7)
}
 0x131   :  { %137 = dma.hbm_to_vmem [thread:$0]  %s5716_s8, 16, %s135_s3, [#allocation15]  }
 0x132   :  { %s4910_s25 = scalar_lea.hbm %s5718_s10, 16 }
 0x133   :  { %p4911_p8 = scmp.ne.s32.totalorder %s5718_s10, %s4910_s25  ;;  %p4914_p9 = scmp.lt.u32.totalorder %s4910_s25, %s5718_s10 }
 0x135   :  { %p4916_p10 = pnand %p4914_p9, %p4911_p8 }
 0x137   :  { %4919 = shalt.err (!%p4916_p10)
}
 0x138   :  { %s4920_s19 = scalar_lea.vmem %s155_s21, 16  ;;  %s4924_s7 = scalar_lea.vmem %s155_s21, 32 }
 0x139   :  { %p4921_p11 = scmp.ne.s32.totalorder %s155_s21, %s4920_s19  ;;  %p4925_p12 = scmp.lt.s32.totalorder %s155_s21, %s155_s21 }
 0x13a   :  { %p4926_p13 = scmp.lt.s32.totalorder %s4924_s7, %s4920_s19 }
 0x13c   :  { %p4927_p0 = por %p4926_p13, %p4925_p12 }
 0x13e   :  { %p4928_p1 = pnand %p4927_p0, %p4921_p11 }
 0x140   :  { %4931 = shalt.err (!%p4928_p1)
}
 0x141   :  { %157 = dma.hbm_to_vmem [thread:$0]  %s5718_s10, 16, %s155_s21, [#allocation18]  }
 0x142   :  { %s5106_s11 = smov [#allocation22]   ;;  %s5107_s30 = smov [#allocation25]  }
 0x143   :  { %s175_s22 = sshll.u32 %s5106_s11, 4  ;;  %s198_s24 = sshll.u32 %s5107_s30, 4  ;;  %s176_s22 = int_to_ptr.vmem [resolvable:$true] %s175_s22  ;;  %s199_s24 = int_to_ptr.vmem [resolvable:$true] %s198_s24 }
 0x144   :  { %s4932_s9 = scalar_lea.hbm %s5720_s12, 6144 }
 0x145   :  { %p4933_p2 = scmp.ne.s32.totalorder %s5720_s12, %s4932_s9  ;;  %p4936_p3 = scmp.lt.u32.totalorder %s4932_s9, %s5720_s12 }
 0x147   :  { %p4938_p4 = pnand %p4936_p3, %p4933_p2 }
 0x149   :  { %4941 = shalt.err (!%p4938_p4)
}
 0x14a   :  { %s4942_s10 = scalar_lea.vmem %s176_s22, 6144  ;;  %p4947_p6 = scmp.lt.s32.totalorder %s176_s22, %s176_s22 }
 0x14b   :  { %p4943_p5 = scmp.ne.s32.totalorder %s176_s22, %s4942_s10  ;;  %p4948_p7 = scmp.lt.s32.totalorder %s4942_s10, %s4942_s10 }
 0x14d   :  { %p4949_p8 = por %p4948_p7, %p4947_p6 }
 0x14f   :  { %p4950_p9 = pnand %p4949_p8, %p4943_p5 }
 0x151   :  { %4953 = shalt.err (!%p4950_p9)
}
 0x152   :  { %181 = dma.hbm_to_vmem [thread:$0]  %s5720_s12, 6144, %s176_s22, [#allocation21], %s5752_s23, %s5752_s23, %s5751_s28  }
 0x153   :  { %s4954_s26 = scalar_lea.hbm %s5722_s14, 16 }
 0x154   :  { %p4955_p10 = scmp.ne.s32.totalorder %s5722_s14, %s4954_s26  ;;  %p4958_p11 = scmp.lt.u32.totalorder %s4954_s26, %s5722_s14 }
 0x156   :  { %p4960_p12 = pnand %p4958_p11, %p4955_p10 }
 0x158   :  { %4963 = shalt.err (!%p4960_p12)
}
 0x159   :  { %s4964_s7 = scalar_lea.vmem %s199_s24, 16  ;;  %s4968_s8 = scalar_lea.vmem %s199_s24, 32 }
 0x15a   :  { %p4965_p13 = scmp.ne.s32.totalorder %s199_s24, %s4964_s7  ;;  %p4969_p0 = scmp.lt.s32.totalorder %s199_s24, %s199_s24 }
 0x15b   :  { %p4970_p1 = scmp.lt.s32.totalorder %s4968_s8, %s4964_s7 }
 0x15d   :  { %p4971_p2 = por %p4970_p1, %p4969_p0 }
 0x15f   :  { %p4972_p3 = pnand %p4971_p2, %p4965_p13 }
 0x161   :  { %4975 = shalt.err (!%p4972_p3)
}
 0x162   :  { %201 = dma.hbm_to_vmem [thread:$0]  %s5722_s14, 16, %s199_s24, [#allocation24]  }
 0x163   :  { %s5108_s11 = smov [#allocation28]   ;;  %s5109_s30 = smov [#allocation31]  }
 0x164   :  { %s217_s22 = sshll.u32 %s5108_s11, 4  ;;  %s242_s17 = sshll.u32 %s5109_s30, 4  ;;  %s218_s22 = int_to_ptr.vmem [resolvable:$true] %s217_s22  ;;  %s243_s17 = int_to_ptr.vmem [resolvable:$true] %s242_s17 }
 0x165   :  { %s4976_s6 = scalar_lea.hbm %s5724_s16, 384 }
 0x166   :  { %p4977_p4 = scmp.ne.s32.totalorder %s5724_s16, %s4976_s6  ;;  %p4980_p5 = scmp.lt.u32.totalorder %s4976_s6, %s5724_s16 }
 0x168   :  { %p4982_p6 = pnand %p4980_p5, %p4977_p4 }
 0x16a   :  { %4985 = shalt.err (!%p4982_p6)
}
 0x16b   :  { %s4986_s14 = scalar_lea.vmem %s218_s22, 384  ;;  %p4991_p8 = scmp.lt.s32.totalorder %s218_s22, %s218_s22 }
 0x16c   :  { %p4987_p7 = scmp.ne.s32.totalorder %s218_s22, %s4986_s14  ;;  %p4992_p9 = scmp.lt.s32.totalorder %s4986_s14, %s4986_s14 }
 0x16e   :  { %p4993_p10 = por %p4992_p9, %p4991_p8 }
 0x170   :  { %p4994_p11 = pnand %p4993_p10, %p4987_p7 }
 0x172   :  { %4997 = shalt.err (!%p4994_p11)
}
 0x173   :  { %223 = dma.hbm_to_vmem [thread:$0]  %s5724_s16, 384, %s218_s22, [#allocation27], %s5752_s23, %s5752_s23, %s5751_s28  }
 0x174   :  { %s4998_s25 = scalar_lea.hbm %s5726_s18, 16 }
 0x175   :  { %p4999_p12 = scmp.ne.s32.totalorder %s5726_s18, %s4998_s25  ;;  %p5002_p13 = scmp.lt.u32.totalorder %s4998_s25, %s5726_s18 }
 0x177   :  { %p5004_p0 = pnand %p5002_p13, %p4999_p12 }
 0x179   :  { %5007 = shalt.err (!%p5004_p0)
}
 0x17a   :  { %s5008_s19 = scalar_lea.vmem %s243_s17, 16  ;;  %s5012_s7 = scalar_lea.vmem %s243_s17, 32 }
 0x17b   :  { %p5009_p1 = scmp.ne.s32.totalorder %s243_s17, %s5008_s19  ;;  %p5013_p2 = scmp.lt.s32.totalorder %s243_s17, %s243_s17 }
 0x17c   :  { %p5014_p3 = scmp.lt.s32.totalorder %s5012_s7, %s5008_s19 }
 0x17e   :  { %p5015_p4 = por %p5014_p3, %p5013_p2 }
 0x180   :  { %p5016_p5 = pnand %p5015_p4, %p5009_p1 }
 0x182   :  { %5019 = shalt.err (!%p5016_p5)
}
 0x183   :  { %245 = dma.hbm_to_vmem [thread:$0]  %s5726_s18, 16, %s243_s17, [#allocation30]  }
 0x184   :  { %s5110_s23 = smov [#allocation34]   ;;  %s5020_s11 = scalar_lea.hbm %s5728_s20, 16 }
 0x185   :  { %s262_s8 = sshll.u32 %s5110_s23, 4  ;;  %p5021_p6 = scmp.ne.s32.totalorder %s5728_s20, %s5020_s11  ;;  %s263_s8 = int_to_ptr.vmem [resolvable:$true] %s262_s8 }
 0x186   :  { %p5024_p7 = scmp.lt.u32.totalorder %s5020_s11, %s5728_s20 }
 0x188   :  { %p5026_p8 = pnand %p5024_p7, %p5021_p6 }
 0x18a   :  { %5029 = shalt.err (!%p5026_p8)
}
 0x18b   :  { %s5030_s6 = scalar_lea.vmem %s263_s8, 16  ;;  %s5034_s18 = scalar_lea.vmem %s263_s8, 32 }
 0x18c   :  { %p5031_p9 = scmp.ne.s32.totalorder %s263_s8, %s5030_s6  ;;  %p5035_p10 = scmp.lt.s32.totalorder %s263_s8, %s263_s8 }
 0x18d   :  { %p5036_p11 = scmp.lt.s32.totalorder %s5034_s18, %s5030_s6 }
 0x18f   :  { %p5037_p12 = por %p5036_p11, %p5035_p10 }
 0x191   :  { %p5038_p13 = pnand %p5037_p12, %p5031_p9 }
 0x193   :  { %5041 = shalt.err (!%p5038_p13)
}
 0x194   :  { %265 = dma.hbm_to_vmem [thread:$0]  %s5728_s20, 16, %s263_s8, [#allocation33]  }
 0x195   :  { %5064 = dma.done.wait [#allocation3], 2048  }
 0x196   :  { %5065 = vsyncadd [#allocation3], 4294965248 }
 0x197   :  { %5066 = dma.done.wait [#allocation6], 6144  }
 0x198   :  { %5067 = vsyncadd [#allocation6], 4294961152 }
 0x199   :  { %5068 = dma.done.wait [#allocation9], 32  }
 0x19a   :  { %5069 = vsyncadd [#allocation9], 4294967264 }
 0x19b   :  { %5070 = dma.done.wait [#allocation12], 1552  }
 0x19c   :  { %5071 = vsyncadd [#allocation12], 4294965744 }
 0x19d   :  { %5072 = dma.done.wait [#allocation15], 6160  }
 0x19e   :  { %5073 = vsyncadd [#allocation15], 4294961136 }
 0x19f   :  { %5074 = dma.done.wait [#allocation18], 32  }
 0x1a0   :  { %5075 = vsyncadd [#allocation18], 4294967264 }
 0x1a1   :  { %5076 = dma.done.wait [#allocation21], 6912  }
 0x1a2   :  { %5077 = vsyncadd [#allocation21], 4294960384 }
 0x1a3   :  { %5078 = dma.done.wait [#allocation24], 32  }
 0x1a4   :  { %5079 = vsyncadd [#allocation24], 4294967264 }
 0x1a5   :  { %5080 = dma.done.wait [#allocation27], 400  }
 0x1a6   :  { %5081 = vsyncadd [#allocation27], 4294966896 }
 0x1a7   :  { %5082 = dma.done.wait [#allocation30], 6160  }
 0x1a8   :  { %5083 = vsyncadd [#allocation30], 4294961136 }
 0x1a9   :  { %5084 = dma.done.wait [#allocation33], 32  }
 0x1aa   :  { %5085 = vsyncadd [#allocation33], 4294967264  ;;  %v329_v0 = vld [vmem:[#allocation2] sm:$0xff]  ;;  %v330_v1 = vld [vmem:[#allocation2 + $0x8] sm:$0xff]  ;;  %vm467_vm0 = vcmask 523264   ;;  %vm1851_vm9 = vcmask 261120  }
 0x1ab   :  { %v331_v2 = vld [vmem:[#allocation2 + $0x10] sm:$0xff]  ;;  %v5540_v3 = vpack.c.bf16 %v330_v1, %v329_v0  ;;  %v332_v4 = vld [vmem:[#allocation2 + $0x18] sm:$0xff]  ;;  %v333_v6 = vld [vmem:[#allocation2 + $0x20] sm:$0xff]  ;;  %vm5112_vm14 = vmmov 0   ;;  %s5114_s20 = smov [#allocation35]  }
 0x1ac   :  { %v5542_v5 = vpack.c.bf16 %v332_v4, %v331_v2  ;;  %v334_v7 = vld [vmem:[#allocation2 + $0x28] sm:$0xff]  ;;  %v346_v9 = vld [vmem:[#allocation5] sm:$0xff]  ;;  %v335_v10 = vld [vmem:[#allocation2 + $0x30] sm:$0xff]  ;;  %s2933_s2 = sshll.u32 %s5114_s20, 4  ;;  %s2934_s2 = int_to_ptr.vmem [resolvable:$true] %s2933_s2 }
 0x1ad   :  { %4018 = vmatprep.subr.bf16.mxu1 %v5540_v3  ;;  %4114 = vmatprep.subr.bf16.mxu0 %v5540_v3  ;;  %v5549_v8 = vpack.c.bf16 %v334_v7, %v333_v6  ;;  %v336_v11 = vld [vmem:[#allocation2 + $0x38] sm:$0xff]  ;;  %v337_v13 = vld [vmem:[#allocation2 + $0x40] sm:$0xff]  ;;  %v338_v14 = vld [vmem:[#allocation2 + $0x48] sm:$0xff]  ;;  %s5042_s27 = scalar_lea.vmem %s2934_s2, 128  ;;  %p5047_p1 = scmp.lt.s32.totalorder %s2934_s2, %s2934_s2 }
 0x1ae   :  { %4020 = vmatpush3.bf16.msra.mxu1 %v5540_v3  ;;  %4116 = vmatpush3.bf16.msra.mxu0 %v5540_v3  ;;  %v5555_v12 = vpack.c.bf16 %v336_v11, %v335_v10  ;;  %v5561_v15 = vpack.c.bf16 %v338_v14, %v337_v13  ;;  %v339_v16 = vld [vmem:[#allocation2 + $0x50] sm:$0xff]  ;;  %v340_v17 = vld [vmem:[#allocation2 + $0x58] sm:$0xff]  ;;  %v341_v19 = vld [vmem:[#allocation2 + $0x60] sm:$0xff]  ;;  %p5043_p0 = scmp.ne.s32.totalorder %s2934_s2, %s5042_s27  ;;  %p5048_p2 = scmp.lt.s32.totalorder %s5042_s27, %s5042_s27 }
 0x1af   :  { %4022 = vmatprep.subr.bf16.mxu1 %v5542_v5  ;;  %4118 = vmatprep.subr.bf16.mxu0 %v5542_v5  ;;  %v5567_v18 = vpack.c.bf16 %v340_v17, %v339_v16  ;;  %v342_v20 = vld [vmem:[#allocation2 + $0x68] sm:$0xff]  ;;  %v343_v22 = vld [vmem:[#allocation2 + $0x70] sm:$0xff]  ;;  %v344_v23 = vld [vmem:[#allocation2 + $0x78] sm:$0xff] }
 0x1b0   :  { %3389 = vmatprep.mubr.f32.mxu1 %v346_v9  ;;  %v5573_v21 = vpack.c.bf16 %v342_v20, %v341_v19  ;;  %v5579_v24 = vpack.c.bf16 %v344_v23, %v343_v22  ;;  %v459_v25 = vld [vmem:[#allocation7] sm:$0xff]  ;;  %v460_v26 = vld [vmem:[#allocation7 + $0x8] sm:$0xff]  ;;  %v461_v28 = vld [vmem:[#allocation7 + $0x10] sm:$0xff]  ;;  %p5049_p3 = por %p5048_p2, %p5047_p1 }
 0x1b1   :  { %v4049_v27 = vpack.c.bf16 %v460_v26, %v459_v25  ;;  %v462_v29 = vld [vmem:[#allocation7 + $0x18] sm:$0xff]  ;;  %v347_v30 = vld [vmem:[#allocation5 + $0x8] sm:$0xff]  ;;  %v348_v31 = vld [vmem:[#allocation5 + $0x10] sm:$0xff] }
 0x1b2   :  { %4024 = vmatpush3.bf16.msra.mxu1 %v5542_v5  ;;  %4120 = vmatpush3.bf16.msra.mxu0 %v5542_v5  ;;  %v4053_v32 = vpack.c.bf16 %v462_v29, %v461_v28  ;;  %v463_v33 = vld [vmem:[#allocation7 + $0x20] sm:$0xff]  ;;  %v464_v34 = vld [vmem:[#allocation7 + $0x28] sm:$0xff]  ;;  %v349_v35 = vld [vmem:[#allocation5 + $0x18] sm:$0xff]  ;;  %p5050_p4 = pnand %p5049_p3, %p5043_p0 }
 0x1b3   :  { %4026 = vmatprep.subr.bf16.mxu1 %v5549_v8  ;;  %4122 = vmatprep.subr.bf16.mxu0 %v5549_v8  ;;  %v350_v36 = vld [vmem:[#allocation5 + $0x20] sm:$0xff]  ;;  %v4057_v37 = vpack.c.bf16 %v464_v34, %v463_v33  ;;  %v465_v38 = vld [vmem:[#allocation7 + $0x30] sm:$0xff]  ;;  %v466_v39 = vld [vmem:[#allocation7 + $0x38] sm:$0xff] }
 0x1b4   :  { %v351_v40 = vld [vmem:[#allocation5 + $0x28] sm:$0xff]  ;;  %v352_v41 = vld [vmem:[#allocation5 + $0x30] sm:$0xff]  ;;  %v4061_v42 = vpack.c.bf16 %v466_v39, %v465_v38  ;;  %v353_v43 = vld [vmem:[#allocation5 + $0x38] sm:$0xff] }
 0x1b5   :  { %v872_v44 = vld [vmem:[#allocation5 + $0x80] sm:$0xff]  ;;  %v873_v45 = vld [vmem:[#allocation5 + $0x88] sm:$0xff]  ;;  %v874_v46 = vld [vmem:[#allocation5 + $0x90] sm:$0xff] }
 0x1b6   :  { %4028 = vmatpush3.bf16.msra.mxu1 %v5549_v8  ;;  %4124 = vmatpush3.bf16.msra.mxu0 %v5549_v8  ;;  %v875_v47 = vld [vmem:[#allocation5 + $0x98] sm:$0xff]  ;;  %v876_v48 = vld [vmem:[#allocation5 + $0xa0] sm:$0xff]  ;;  %v877_v49 = vld [vmem:[#allocation5 + $0xa8] sm:$0xff] }
 0x1b7   :  { %4030 = vmatprep.subr.bf16.mxu1 %v5555_v12  ;;  %4126 = vmatprep.subr.bf16.mxu0 %v5555_v12  ;;  %v878_v50 = vld [vmem:[#allocation5 + $0xb0] sm:$0xff]  ;;  %v879_v51 = vld [vmem:[#allocation5 + $0xb8] sm:$0xff]  ;;  %v612_v60 = vld [vmem:[#allocation5 + $0x40] sm:$0xff] }
 0x1b8   :  { %3533 = vmatprep.mubr.f32.mxu0 %v872_v44  ;;  %v726_v61 = vld [vmem:[#allocation7 + $0x40] sm:$0xff]  ;;  %v727_v62 = vld [vmem:[#allocation7 + $0x48] sm:$0xff]  ;;  %v728_v0 = vld [vmem:[#allocation7 + $0x50] sm:$0xff] }
 0x1b9   :  { %v4097_v63 = vpack.c.bf16 %v727_v62, %v726_v61  ;;  %v729_v1 = vld [vmem:[#allocation7 + $0x58] sm:$0xff]  ;;  %v613_v2 = vld [vmem:[#allocation5 + $0x48] sm:$0xff]  ;;  %v732_v10 = vld [vmem:[#allocation7 + $0x70] sm:$0xff] }
 0x1ba   :  { %4032 = vmatpush3.bf16.msra.mxu1 %v5555_v12  ;;  %4128 = vmatpush3.bf16.msra.mxu0 %v5555_v12  ;;  %v4101_v4 = vpack.c.bf16 %v729_v1, %v728_v0  ;;  %v731_v6 = vld [vmem:[#allocation7 + $0x68] sm:$0xff]  ;;  %v615_v7 = vld [vmem:[#allocation5 + $0x58] sm:$0xff]  ;;  %v618_v13 = vld [vmem:[#allocation5 + $0x70] sm:$0xff] }
 0x1bb   :  { %4034 = vmatprep.subr.bf16.mxu1 %v5561_v15  ;;  %4130 = vmatprep.subr.bf16.mxu0 %v5561_v15  ;;  %v733_v11 = vld [vmem:[#allocation7 + $0x78] sm:$0xff]  ;;  %v986_v16 = vld [vmem:[#allocation7 + $0x80] sm:$0xff]  ;;  %v987_v17 = vld [vmem:[#allocation7 + $0x88] sm:$0xff] }
 0x1bc   :  { %v4109_v14 = vpack.c.bf16 %v733_v11, %v732_v10  ;;  %v989_v28 = vld [vmem:[#allocation7 + $0x98] sm:$0xff]  ;;  %v991_v33 = vld [vmem:[#allocation7 + $0xa8] sm:$0xff] }
 0x1bd   :  { %v993_v38 = vld [vmem:[#allocation7 + $0xb8] sm:$0xff]  ;;  %v1186_v44 = vld [vmem:[#allocation13] sm:$0xff] }
 0x1be   :  { %4036 = vmatpush3.bf16.msra.mxu1 %v5561_v15  ;;  %4132 = vmatpush3.bf16.msra.mxu0 %v5561_v15 }
 0x1bf   :  { %4038 = vmatprep.subr.bf16.mxu1 %v5567_v18  ;;  %4134 = vmatprep.subr.bf16.mxu0 %v5567_v18 }
 0x1c2   :  { %4040 = vmatpush3.bf16.msra.mxu1 %v5567_v18  ;;  %4136 = vmatpush3.bf16.msra.mxu0 %v5567_v18 }
 0x1c3   :  { %4042 = vmatprep.subr.bf16.mxu1 %v5573_v21  ;;  %4138 = vmatprep.subr.bf16.mxu0 %v5573_v21 }
 0x1c6   :  { %4044 = vmatpush3.bf16.msra.mxu1 %v5573_v21  ;;  %4140 = vmatpush3.bf16.msra.mxu0 %v5573_v21 }
 0x1c7   :  { %4046 = vmatprep.subr.bf16.mxu1 %v5579_v24  ;;  %4142 = vmatprep.subr.bf16.mxu0 %v5579_v24 }
 0x1ca   :  { %4048 = vmatpush3.bf16.msra.mxu1 %v5579_v24  ;;  %4144 = vmatpush3.bf16.msra.mxu0 %v5579_v24 }
 0x1cb   :  { %4050 = vmatprep.subr.bf16.mxu1 %v4049_v27 }
 0x1cd   :  { %3390 = vmatmul.mubr.f32.vlgmr.msra.gmra.mrb[0].mxu1 %v347_v30  ;;  %3534 = vmatmul.mubr.f32.vlgmr.msra.gmra.mrb[0].mxu0 %v873_v45  ;;  %v1399_v45 = vld [vmem:[#allocation13 + $0x20] sm:$0xff] }
 0x1ce   :  { %3392 = vmatprep.mubr.f32.mxu1 %v348_v31  ;;  %4052 = vmatpush3.bf16.msra.mxu1 %v4049_v27  ;;  %v988_v27 = vld [vmem:[#allocation7 + $0x90] sm:$0xff] }
 0x1cf   :  { %4054 = vmatprep.subr.bf16.mxu1 %v4053_v32  ;;  %3536 = vmatprep.mubr.f32.mxu0 %v874_v46  ;;  %v4149_v31 = vpack.c.bf16 %v989_v28, %v988_v27  ;;  %v2960_v46 = vld [vmem:[#allocation8] ss:$0 sm:$0xff] }
 0x1d1   :  { %3393 = vmatmul.mubr.f32.gmra.mrb[2].mxu1 %v349_v35  ;;  %3537 = vmatmul.mubr.f32.gmra.mrb[2].mxu0 %v875_v47 }
 0x1d2   :  { %3395 = vmatprep.mubr.f32.mxu1 %v350_v36  ;;  %4056 = vmatpush3.bf16.msra.mxu1 %v4053_v32  ;;  %v990_v32 = vld [vmem:[#allocation7 + $0xa0] sm:$0xff] }
 0x1d3   :  { %4058 = vmatprep.subr.bf16.mxu1 %v4057_v37  ;;  %3539 = vmatprep.mubr.f32.mxu0 %v876_v48  ;;  %v4153_v36 = vpack.c.bf16 %v991_v33, %v990_v32 }
 0x1d5   :  { %3396 = vmatmul.mubr.f32.gmra.mrb[4].mxu1 %v351_v40  ;;  %3540 = vmatmul.mubr.f32.gmra.mrb[4].mxu0 %v877_v49 }
 0x1d6   :  { %3398 = vmatprep.mubr.f32.mxu1 %v352_v41  ;;  %4060 = vmatpush3.bf16.msra.mxu1 %v4057_v37  ;;  %v992_v37 = vld [vmem:[#allocation7 + $0xb0] sm:$0xff] }
 0x1d7   :  { %4062 = vmatprep.subr.bf16.mxu1 %v4061_v42  ;;  %3542 = vmatprep.mubr.f32.mxu0 %v878_v50  ;;  %v4157_v41 = vpack.c.bf16 %v993_v38, %v992_v37 }
 0x1d9   :  { %3399 = vmatmul.mubr.f32.gmra.mrb[6].mxu1 %v353_v43  ;;  %3543 = vmatmul.mubr.f32.gmra.mrb[6].mxu0 %v879_v51 }
 0x1da   :  { %4064 = vmatpush3.bf16.msra.mxu1 %v4061_v42  ;;  %3589 = vmatprep.mubr.msk.f32.mxu0 %vm467_vm0, %v1186_v44  ;;  %v1289_v44 = vld [vmem:[#allocation14 + $0x10] sm:$0xff] }
 0x1db   :  { %4066 = vmatprep.subr.bf16.mxu1 %v5540_v3 }
 0x2a0   :  { %v3391_v52 = vpop.f32.mrb[0].mxu1  ;;  %v3535_v19 = vpop.f32.mrb[0].mxu0 }
 0x2a1   :  { %v420_v53 = vpop.f32.mrb[1].mxu1  ;;  %v946_v20 = vpop.f32.mrb[1].mxu0 }
 0x2a2   :  { %3417 = vmatprep.mubr.msk.f32.mxu1 %vm467_vm0, %v420_v53 }
 0x2a3   :  { %3418 = vmatmul.mubr.msk.f32.vlgmr.msra.gmra.mrb[8].mxu1 %vm467_vm0, %v3391_v52  ;;  %v2977_v52 = vld [vmem:[#allocation10] ss:$0 sm:$0xff] }
 0x2a4   :  { %4068 = vmatpush3.bf16.msra.mxu1 %v5540_v3  ;;  %v3394_v54 = vpop.f32.mrb[2].mxu1  ;;  %v614_v3 = vld [vmem:[#allocation5 + $0x50] sm:$0xff] }
 0x2a5   :  { %4070 = vmatprep.subr.bf16.mxu1 %v5542_v5  ;;  %v430_v55 = vpop.f32.mrb[3].mxu1 }
 0x2a6   :  { %3420 = vmatprep.mubr.msk.f32.mxu1 %vm467_vm0, %v430_v55 }
 0x2a7   :  { %3421 = vmatmul.mubr.msk.f32.gmra.mrb[10].mxu1 %vm467_vm0, %v3394_v54 }
 0x2a8   :  { %4072 = vmatpush3.bf16.msra.mxu1 %v5542_v5  ;;  %v3397_v56 = vpop.f32.mrb[4].mxu1  ;;  %v730_v5 = vld [vmem:[#allocation7 + $0x60] sm:$0xff] }
 0x2a9   :  { %4074 = vmatprep.subr.bf16.mxu1 %v5549_v8  ;;  %v440_v57 = vpop.f32.mrb[5].mxu1  ;;  %v4105_v9 = vpack.c.bf16 %v731_v6, %v730_v5 }
 0x2aa   :  { %3423 = vmatprep.mubr.msk.f32.mxu1 %vm467_vm0, %v440_v57 }
 0x2ab   :  { %3424 = vmatmul.mubr.msk.f32.gmra.mrb[12].mxu1 %vm467_vm0, %v3397_v56  ;;  %v2978_v56 = vld [vmem:[#allocation11] ss:$0 sm:$0xff] }
 0x2ac   :  { %4076 = vmatpush3.bf16.msra.mxu1 %v5549_v8  ;;  %v3400_v58 = vpop.f32.mrb[6].mxu1  ;;  %v616_v8 = vld [vmem:[#allocation5 + $0x60] sm:$0xff] }
 0x2ad   :  { %4078 = vmatprep.subr.bf16.mxu1 %v5555_v12  ;;  %v450_v59 = vpop.f32.mrb[7].mxu1 }
 0x2ae   :  { %3426 = vmatprep.mubr.msk.f32.mxu1 %vm467_vm0, %v450_v59 }
 0x2af   :  { %3427 = vmatmul.mubr.msk.f32.gmra.mrb[14].mxu1 %vm467_vm0, %v3400_v58 }
 0x2b0   :  { %4080 = vmatpush3.bf16.msra.mxu1 %v5555_v12  ;;  %3461 = vmatprep.mubr.f32.mxu1 %v612_v60  ;;  %v617_v12 = vld [vmem:[#allocation5 + $0x68] sm:$0xff] }
 0x2b1   :  { %4082 = vmatprep.subr.bf16.mxu1 %v5561_v15 }
 0x2b4   :  { %4084 = vmatpush3.bf16.msra.mxu1 %v5561_v15  ;;  %v619_v15 = vld [vmem:[#allocation5 + $0x78] sm:$0xff] }
 0x2b5   :  { %4086 = vmatprep.subr.bf16.mxu1 %v5567_v18 }
 0x2b8   :  { %4088 = vmatpush3.bf16.msra.mxu1 %v5567_v18  ;;  %v4145_v18 = vpack.c.bf16 %v987_v17, %v986_v16 }
 0x2b9   :  { %4090 = vmatprep.subr.bf16.mxu1 %v5573_v21 }
 0x2bc   :  { %4092 = vmatpush3.bf16.msra.mxu1 %v5573_v21  ;;  %v3538_v21 = vpop.f32.mrb[2].mxu0 }
 0x2bd   :  { %4094 = vmatprep.subr.bf16.mxu1 %v5579_v24  ;;  %v956_v22 = vpop.f32.mrb[3].mxu0 }
 0x2be   :  { %v3541_v23 = vpop.f32.mrb[4].mxu0 }
 0x2c0   :  { %4096 = vmatpush3.bf16.msra.mxu1 %v5579_v24  ;;  %v966_v24 = vpop.f32.mrb[5].mxu0 }
 0x2c1   :  { %4098 = vmatprep.subr.bf16.mxu1 %v4097_v63  ;;  %v3544_v25 = vpop.f32.mrb[6].mxu0 }
 0x2c2   :  { %v976_v26 = vpop.f32.mrb[7].mxu0 }
 0x2c3   :  { %3462 = vmatmul.mubr.f32.vlgmr.msra.gmra.mrb[16].mxu1 %v613_v2 }
 0x2c4   :  { %3464 = vmatprep.mubr.f32.mxu1 %v614_v3  ;;  %4100 = vmatpush3.bf16.msra.mxu1 %v4097_v63 }
 0x2c5   :  { %4102 = vmatprep.subr.bf16.mxu1 %v4101_v4 }
 0x2c7   :  { %3465 = vmatmul.mubr.f32.gmra.mrb[18].mxu1 %v615_v7 }
 0x2c8   :  { %3467 = vmatprep.mubr.f32.mxu1 %v616_v8  ;;  %4104 = vmatpush3.bf16.msra.mxu1 %v4101_v4 }
 0x2c9   :  { %4106 = vmatprep.subr.bf16.mxu1 %v4105_v9 }
 0x2cb   :  { %3468 = vmatmul.mubr.f32.gmra.mrb[20].mxu1 %v617_v12 }
 0x2cc   :  { %3470 = vmatprep.mubr.f32.mxu1 %v618_v13  ;;  %4108 = vmatpush3.bf16.msra.mxu1 %v4105_v9 }
 0x2cd   :  { %4110 = vmatprep.subr.bf16.mxu1 %v4109_v14 }
 0x2cf   :  { %3471 = vmatmul.mubr.f32.gmra.mrb[22].mxu1 %v619_v15 }
 0x2d0   :  { %4112 = vmatpush3.bf16.msra.mxu1 %v4109_v14 }
 0x2d1   :  { %4146 = vmatprep.subr.bf16.mxu1 %v4145_v18 }
 0x396   :  { %v3463_v29 = vpop.f32.mrb[16].mxu1 }
 0x397   :  { %v686_v30 = vpop.f32.mrb[17].mxu1 }
 0x398   :  { %3489 = vmatprep.mubr.msk.f32.mxu1 %vm467_vm0, %v686_v30 }
 0x399   :  { %3490 = vmatmul.mubr.msk.f32.vlgmr.msra.gmra.mrb[8].mxu1 %vm467_vm0, %v3463_v29 }
 0x39a   :  { %v3466_v34 = vpop.f32.mrb[18].mxu1  ;;  %4148 = vmatpush3.bf16.msra.mxu1 %v4145_v18 }
 0x39b   :  { %v696_v35 = vpop.f32.mrb[19].mxu1  ;;  %4150 = vmatprep.subr.bf16.mxu1 %v4149_v31 }
 0x39c   :  { %3492 = vmatprep.mubr.msk.f32.mxu1 %vm467_vm0, %v696_v35  ;;  %v1287_v35 = vld [vmem:[#allocation14] sm:$0xff] }
 0x39d   :  { %3493 = vmatmul.mubr.msk.f32.gmra.mrb[10].mxu1 %vm467_vm0, %v3466_v34 }
 0x39e   :  { %v3469_v39 = vpop.f32.mrb[20].mxu1  ;;  %4152 = vmatpush3.bf16.msra.mxu1 %v4149_v31 }
 0x39f   :  { %v706_v40 = vpop.f32.mrb[21].mxu1  ;;  %4154 = vmatprep.subr.bf16.mxu1 %v4153_v36 }
 0x3a0   :  { %3495 = vmatprep.mubr.msk.f32.mxu1 %vm467_vm0, %v706_v40  ;;  %v1187_v40 = vld [vmem:[#allocation13 + $0x8] sm:$0xff] }
 0x3a1   :  { %3496 = vmatmul.mubr.msk.f32.gmra.mrb[12].mxu1 %vm467_vm0, %v3469_v39 }
 0x3a2   :  { %v3472_v42 = vpop.f32.mrb[22].mxu1  ;;  %4156 = vmatpush3.bf16.msra.mxu1 %v4153_v36  ;;  %v1288_v36 = vld [vmem:[#allocation14 + $0x8] sm:$0xff] }
 0x3a3   :  { %v716_v43 = vpop.f32.mrb[23].mxu1  ;;  %4158 = vmatprep.subr.bf16.mxu1 %v4157_v41  ;;  %v4177_v39 = vpack.c.bf16 %v1288_v36, %v1287_v35  ;;  %v1513_v35 = vld [vmem:[#allocation14 + $0xe0] sm:$0xff]  ;;  %v1514_v36 = vld [vmem:[#allocation14 + $0xe8] sm:$0xff] }
 0x3a4   :  { %3498 = vmatprep.mubr.msk.f32.mxu1 %vm467_vm0, %v716_v43  ;;  %v1401_v43 = vld [vmem:[#allocation13 + $0x30] sm:$0xff] }
 0x3a5   :  { %3499 = vmatmul.mubr.msk.f32.gmra.mrb[14].mxu1 %vm467_vm0, %v3472_v42  ;;  %v1188_v42 = vld [vmem:[#allocation13 + $0x10] sm:$0xff] }
 0x3a6   :  { %4160 = vmatpush3.bf16.msra.mxu1 %v4157_v41  ;;  %3561 = vmatprep.mubr.msk.f32.mxu1 %vm467_vm0, %v946_v20  ;;  %v1400_v41 = vld [vmem:[#allocation13 + $0x28] sm:$0xff] }
 0x3a9   :  { %3562 = vmatmul.mubr.msk.f32.vlgmr.msra.gmra.mrb[8].mxu1 %vm467_vm0, %v3535_v19 }
 0x3aa   :  { %3564 = vmatprep.mubr.msk.f32.mxu1 %vm467_vm0, %v956_v22 }
 0x3ad   :  { %3565 = vmatmul.mubr.msk.f32.gmra.mrb[10].mxu1 %vm467_vm0, %v3538_v21 }
 0x3ae   :  { %3567 = vmatprep.mubr.msk.f32.mxu1 %vm467_vm0, %v966_v24 }
 0x3b1   :  { %3568 = vmatmul.mubr.msk.f32.gmra.mrb[12].mxu1 %vm467_vm0, %v3541_v23 }
 0x3b2   :  { %3570 = vmatprep.mubr.msk.f32.mxu1 %vm467_vm0, %v976_v26 }
 0x3b5   :  { %3571 = vmatmul.mubr.msk.f32.gmra.mrb[14].mxu1 %vm467_vm0, %v3544_v25 }
 0x3b6   :  { %3649 = vmatprep.mubr.msk.f32.mxu1 %vm467_vm0, %v1399_v45  ;;  %v1290_v45 = vld [vmem:[#allocation14 + $0x18] sm:$0xff] }
 0x47c   :  { %v3563_v47 = vpop.f32.mrb[8].mxu1 }
 0x47d   :  { %v4506_v48 = vadd.f32 %v3563_v47, %v2960_v46  ;;  %v1084_v49 = vpop.f32.mrb[9].mxu1  ;;  %v1402_v47 = vld [vmem:[#allocation13 + $0x38] sm:$0xff] }
 0x47e   :  { %v4507_v50 = vadd.f32 %v2960_v46, %v1084_v49  ;;  %v1292_v49 = vld [vmem:[#allocation14 + $0x28] sm:$0xff] }
 0x47f   :  { %vm1132_vm1 = vcmp.gt.f32.partialorder %v4506_v48, 0.0  ;;  %v1140_v51 = vmul.f32 0.2, %v4506_v48 }
 0x480   :  { %vm1131_vm2 = vcmp.gt.f32.partialorder %v4507_v50, 0.0  ;;  %v1139_v53 = vmul.f32 0.2, %v4507_v50  ;;  %v3566_v54 = vpop.f32.mrb[10].mxu1 }
 0x481   :  { %v1148_v55 = vsel %vm1132_vm1, %v4506_v48, %v1140_v51  ;;  %v4508_v57 = vadd.f32 %v3566_v54, %v2960_v46  ;;  %v1094_v58 = vpop.f32.mrb[11].mxu1  ;;  %v1291_v48 = vld [vmem:[#allocation14 + $0x20] sm:$0xff]  ;;  %v4181_v51 = vpack.c.bf16 %v1290_v45, %v1289_v44  ;;  %v1294_v54 = vld [vmem:[#allocation14 + $0x38] sm:$0xff]  ;;  %v1710_v44 = vld [vmem:[#allocation14 + $0x108] sm:$0xff]  ;;  %vm2414_vm1 = vcmask 130048  }
 0x482   :  { %v1163_v59 = vmul.f32 %v2977_v52, %v1148_v55  ;;  %v1147_v60 = vsel %vm1131_vm2, %v4507_v50, %v1139_v53  ;;  %v4509_v61 = vadd.f32 %v2960_v46, %v1094_v58  ;;  %v1607_v50 = vld [vmem:[#allocation13 + $0x40] sm:$0xff]  ;;  %v1293_v53 = vld [vmem:[#allocation14 + $0x30] sm:$0xff] }
 0x483   :  { %v1162_v62 = vmul.f32 %v2977_v52, %v1147_v60  ;;  %vm1134_vm3 = vcmp.gt.f32.partialorder %v4508_v57, 0.0  ;;  %v1142_v63 = vmul.f32 0.2, %v4508_v57  ;;  %v4189_v55 = vpack.c.bf16 %v1294_v54, %v1293_v53  ;;  %v1297_v60 = vld [vmem:[#allocation14 + $0x50] sm:$0xff]  ;;  %v1716_v53 = vld [vmem:[#allocation14 + $0x138] sm:$0xff] }
 0x484   :  { %v1178_v0 = vadd.f32 %v2978_v56, %v1163_v59  ;;  %vm1133_vm4 = vcmp.gt.f32.partialorder %v4509_v61, 0.0  ;;  %v1141_v1 = vmul.f32 0.2, %v4509_v61  ;;  %v3569_v2 = vpop.f32.mrb[12].mxu1  ;;  %v1608_v59 = vld [vmem:[#allocation13 + $0x48] sm:$0xff] }
 0x485   :  { %v1177_v3 = vadd.f32 %v2978_v56, %v1162_v62  ;;  %v1150_v4 = vsel %vm1134_vm3, %v4508_v57, %v1142_v63  ;;  %v4510_v5 = vadd.f32 %v3569_v2, %v2960_v46  ;;  %v1104_v6 = vpop.f32.mrb[13].mxu1  ;;  %v1296_v57 = vld [vmem:[#allocation14 + $0x48] sm:$0xff]  ;;  %v1609_v62 = vld [vmem:[#allocation13 + $0x50] sm:$0xff] }
 0x486   :  { %v1165_v7 = vmul.f32 %v2977_v52, %v1150_v4  ;;  %v1149_v8 = vsel %vm1133_vm4, %v4509_v61, %v1141_v1  ;;  %v4511_v9 = vadd.f32 %v2960_v46, %v1104_v6  ;;  %v1298_v61 = vld [vmem:[#allocation14 + $0x58] sm:$0xff]  ;;  %v1299_v1 = vld [vmem:[#allocation14 + $0x60] sm:$0xff]  ;;  %v1300_v2 = vld [vmem:[#allocation14 + $0x68] sm:$0xff] }
 0x487   :  { %v4161_v10 = vpack.c.bf16 %v1178_v0, %v1177_v3  ;;  %v1164_v11 = vmul.f32 %v2977_v52, %v1149_v8  ;;  %vm1136_vm5 = vcmp.gt.f32.partialorder %v4510_v5, 0.0  ;;  %v1144_v12 = vmul.f32 0.2, %v4510_v5  ;;  %v1610_v0 = vld [vmem:[#allocation13 + $0x58] sm:$0xff]  ;;  %v1301_v4 = vld [vmem:[#allocation14 + $0x70] sm:$0xff]  ;;  %v1502_v8 = vld [vmem:[#allocation14 + $0x88] sm:$0xff] }
 0x488   :  { %v1180_v13 = vadd.f32 %v2978_v56, %v1165_v7  ;;  %vm1135_vm6 = vcmp.gt.f32.partialorder %v4511_v9, 0.0  ;;  %v1143_v14 = vmul.f32 0.2, %v4511_v9  ;;  %v3572_v15 = vpop.f32.mrb[14].mxu1  ;;  %v4197_v63 = vpack.c.bf16 %v1298_v61, %v1297_v60  ;;  %v1501_v7 = vld [vmem:[#allocation14 + $0x80] sm:$0xff] }
 0x489   :  { %v1179_v16 = vadd.f32 %v2978_v56, %v1164_v11  ;;  %v1152_v17 = vsel %vm1136_vm5, %v4510_v5, %v1144_v12  ;;  %v4512_v18 = vadd.f32 %v3572_v15, %v2960_v46  ;;  %v1114_v19 = vpop.f32.mrb[15].mxu1  ;;  %4162 = vmatprep.subr.bf16.mxu0 %v4161_v10  ;;  %4210 = vmatprep.subr.bf16.mxu1 %v4161_v10  ;;  %v1302_v5 = vld [vmem:[#allocation14 + $0x78] sm:$0xff]  ;;  %v1721_v61 = vld [vmem:[#allocation14 + $0x160] sm:$0xff] }
 0x48a   :  { %v1167_v20 = vmul.f32 %v2977_v52, %v1152_v17  ;;  %v1151_v21 = vsel %vm1135_vm6, %v4511_v9, %v1143_v14  ;;  %v4513_v22 = vadd.f32 %v2960_v46, %v1114_v19  ;;  %4164 = vmatpush3.bf16.msra.mxu0 %v4161_v10  ;;  %4212 = vmatpush3.bf16.msra.mxu1 %v4161_v10  ;;  %v1189_v46 = vld [vmem:[#allocation13 + $0x18] sm:$0xff]  ;;  %v1505_v17 = vld [vmem:[#allocation14 + $0xa0] sm:$0xff] }
 0x48b   :  { %v4165_v23 = vpack.c.bf16 %v1180_v13, %v1179_v16  ;;  %v1166_v24 = vmul.f32 %v2977_v52, %v1151_v21  ;;  %vm1138_vm7 = vcmp.gt.f32.partialorder %v4512_v18, 0.0  ;;  %v1146_v25 = vmul.f32 0.2, %v4512_v18  ;;  %v1504_v11 = vld [vmem:[#allocation14 + $0x98] sm:$0xff] }
 0x48c   :  { %v1182_v26 = vadd.f32 %v2978_v56, %v1167_v20  ;;  %vm1137_vm8 = vcmp.gt.f32.partialorder %v4513_v22, 0.0  ;;  %v1145_v27 = vmul.f32 0.2, %v4513_v22  ;;  %v4201_v3 = vpack.c.bf16 %v1300_v2, %v1299_v1  ;;  %v1724_v1 = vld [vmem:[#allocation14 + $0x178] sm:$0xff] }
 0x48d   :  { %v1181_v28 = vadd.f32 %v2978_v56, %v1166_v24  ;;  %v1154_v29 = vsel %vm1138_vm7, %v4512_v18, %v1146_v25  ;;  %4166 = vmatprep.subr.bf16.mxu0 %v4165_v23  ;;  %4214 = vmatprep.subr.bf16.mxu1 %v4165_v23  ;;  %v4205_v6 = vpack.c.bf16 %v1302_v5, %v1301_v4  ;;  %v1506_v18 = vld [vmem:[#allocation14 + $0xa8] sm:$0xff]  ;;  %v1507_v24 = vld [vmem:[#allocation14 + $0xb0] sm:$0xff]  ;;  %v1508_v25 = vld [vmem:[#allocation14 + $0xb8] sm:$0xff] }
 0x48e   :  { %v1169_v30 = vmul.f32 %v2977_v52, %v1154_v29  ;;  %v1153_v31 = vsel %vm1137_vm8, %v4513_v22, %v1145_v27  ;;  %4168 = vmatpush3.bf16.msra.mxu0 %v4165_v23  ;;  %4216 = vmatpush3.bf16.msra.mxu1 %v4165_v23  ;;  %v4225_v9 = vpack.c.bf16 %v1502_v8, %v1501_v7  ;;  %v1509_v27 = vld [vmem:[#allocation14 + $0xc0] sm:$0xff] }
 0x48f   :  { %v4169_v32 = vpack.c.bf16 %v1182_v26, %v1181_v28  ;;  %v1168_v33 = vmul.f32 %v2977_v52, %v1153_v31  ;;  %v4185_v52 = vpack.c.bf16 %v1292_v49, %v1291_v48  ;;  %v4233_v21 = vpack.c.bf16 %v1506_v18, %v1505_v17  ;;  %v1510_v28 = vld [vmem:[#allocation14 + $0xc8] sm:$0xff]  ;;  %v1512_v31 = vld [vmem:[#allocation14 + $0xd8] sm:$0xff]  ;;  %v1713_v49 = vld [vmem:[#allocation14 + $0x120] sm:$0xff] }
 0x490   :  { %v1184_v34 = vadd.f32 %v2978_v56, %v1169_v30  ;;  %v4237_v26 = vpack.c.bf16 %v1508_v25, %v1507_v24  ;;  %v4241_v29 = vpack.c.bf16 %v1510_v28, %v1509_v27  ;;  %v1511_v30 = vld [vmem:[#allocation14 + $0xd0] sm:$0xff]  ;;  %v2983_v4 = vld [vmem:[#allocation16] ss:$0 sm:$0xff] }
 0x491   :  { %v1183_v37 = vadd.f32 %v2978_v56, %v1168_v33  ;;  %4170 = vmatprep.subr.bf16.mxu0 %v4169_v32  ;;  %4218 = vmatprep.subr.bf16.mxu1 %v4169_v32  ;;  %v1295_v56 = vld [vmem:[#allocation14 + $0x40] sm:$0xff]  ;;  %v4245_v33 = vpack.c.bf16 %v1512_v31, %v1511_v30  ;;  %v1933_v31 = vld [vmem:[#allocation22] sm:$0xff] }
 0x492   :  { %4172 = vmatpush3.bf16.msra.mxu0 %v4169_v32  ;;  %4220 = vmatpush3.bf16.msra.mxu1 %v4169_v32  ;;  %v4193_v58 = vpack.c.bf16 %v1296_v57, %v1295_v56  ;;  %v1718_v56 = vld [vmem:[#allocation14 + $0x148] sm:$0xff] }
 0x493   :  { %v4173_v38 = vpack.c.bf16 %v1184_v34, %v1183_v37 }
 0x495   :  { %4174 = vmatprep.subr.bf16.mxu0 %v4173_v38  ;;  %4222 = vmatprep.subr.bf16.mxu1 %v4173_v38 }
 0x496   :  { %4176 = vmatpush3.bf16.msra.mxu0 %v4173_v38  ;;  %4224 = vmatpush3.bf16.msra.mxu1 %v4173_v38 }
 0x497   :  { %4258 = vmatprep.subr.bf16.mxu1 %v4161_v10  ;;  %4178 = vmatprep.subr.bf16.mxu0 %v4177_v39 }
 0x499   :  { %3590 = vmatmul.mubr.msk.f32.vlgmr.msra.gmra.mrb[8].mxu0 %vm467_vm0, %v1187_v40  ;;  %3650 = vmatmul.mubr.msk.f32.vlgmr.msra.gmra.mrb[24].mxu1 %vm467_vm0, %v1400_v41  ;;  %v1515_v40 = vld [vmem:[#allocation14 + $0xf0] sm:$0xff]  ;;  %v1516_v41 = vld [vmem:[#allocation14 + $0xf8] sm:$0xff] }
 0x49a   :  { %4260 = vmatpush3.bf16.msra.mxu1 %v4161_v10  ;;  %3592 = vmatprep.mubr.msk.f32.mxu0 %vm467_vm0, %v1188_v42  ;;  %v1503_v10 = vld [vmem:[#allocation14 + $0x90] sm:$0xff]  ;;  %v4253_v42 = vpack.c.bf16 %v1516_v41, %v1515_v40  ;;  %v1938_v41 = vld [vmem:[#allocation22 + $0x28] sm:$0xff] }
 0x49b   :  { %4262 = vmatprep.subr.bf16.mxu1 %v4165_v23  ;;  %3652 = vmatprep.mubr.msk.f32.mxu1 %vm467_vm0, %v1401_v43  ;;  %v4229_v15 = vpack.c.bf16 %v1504_v11, %v1503_v10  ;;  %v1709_v43 = vld [vmem:[#allocation14 + $0x100] sm:$0xff]  ;;  %v1937_v40 = vld [vmem:[#allocation22 + $0x20] sm:$0xff] }
 0x49c   :  { %4180 = vmatpush3.bf16.msra.mxu0 %v4177_v39  ;;  %v4273_v45 = vpack.c.bf16 %v1710_v44, %v1709_v43  ;;  %v2992_v10 = vld [vmem:[#allocation17] ss:$0 sm:$0xff]  ;;  %v1939_v43 = vld [vmem:[#allocation22 + $0x30] sm:$0xff]  ;;  %v1940_v44 = vld [vmem:[#allocation22 + $0x38] sm:$0xff] }
 0x49d   :  { %3593 = vmatmul.mubr.msk.f32.gmra.mrb[10].mxu0 %vm467_vm0, %v1189_v46  ;;  %3653 = vmatmul.mubr.msk.f32.gmra.mrb[26].mxu1 %vm467_vm0, %v1402_v47  ;;  %v1711_v46 = vld [vmem:[#allocation14 + $0x110] sm:$0xff]  ;;  %v1712_v47 = vld [vmem:[#allocation14 + $0x118] sm:$0xff] }
 0x49e   :  { %4264 = vmatpush3.bf16.msra.mxu1 %v4165_v23  ;;  %3709 = vmatprep.mubr.msk.f32.mxu1 %vm467_vm0, %v1607_v50  ;;  %v4277_v48 = vpack.c.bf16 %v1712_v47, %v1711_v46  ;;  %v1714_v50 = vld [vmem:[#allocation14 + $0x128] sm:$0xff]  ;;  %v1941_v46 = vld [vmem:[#allocation22 + $0x40] sm:$0xff]  ;;  %v1942_v47 = vld [vmem:[#allocation22 + $0x48] sm:$0xff] }
 0x49f   :  { %4266 = vmatprep.subr.bf16.mxu1 %v4169_v32  ;;  %4182 = vmatprep.subr.bf16.mxu0 %v4181_v51 }
 0x4a0   :  { %4184 = vmatpush3.bf16.msra.mxu0 %v4181_v51  ;;  %v4281_v51 = vpack.c.bf16 %v1714_v50, %v1713_v49  ;;  %v1943_v49 = vld [vmem:[#allocation22 + $0x50] sm:$0xff]  ;;  %v1944_v50 = vld [vmem:[#allocation22 + $0x58] sm:$0xff] }
 0x4a1   :  { %4186 = vmatprep.subr.bf16.mxu0 %v4185_v52 }
 0x4a2   :  { %4268 = vmatpush3.bf16.msra.mxu1 %v4169_v32 }
 0x4a3   :  { %4270 = vmatprep.subr.bf16.mxu1 %v4173_v38 }
 0x4a4   :  { %4188 = vmatpush3.bf16.msra.mxu0 %v4185_v52  ;;  %v1715_v52 = vld [vmem:[#allocation14 + $0x130] sm:$0xff] }
 0x4a5   :  { %4190 = vmatprep.subr.bf16.mxu0 %v4189_v55  ;;  %v4285_v54 = vpack.c.bf16 %v1716_v53, %v1715_v52  ;;  %v1945_v52 = vld [vmem:[#allocation22 + $0x60] sm:$0xff]  ;;  %v1946_v53 = vld [vmem:[#allocation22 + $0x68] sm:$0xff] }
 0x4a6   :  { %4272 = vmatpush3.bf16.msra.mxu1 %v4173_v38  ;;  %v4249_v38 = vpack.c.bf16 %v1514_v36, %v1513_v35  ;;  %v1935_v36 = vld [vmem:[#allocation22 + $0x10] sm:$0xff] }
 0x4a8   :  { %4192 = vmatpush3.bf16.msra.mxu0 %v4189_v55  ;;  %v1717_v55 = vld [vmem:[#allocation14 + $0x140] sm:$0xff] }
 0x4a9   :  { %3710 = vmatmul.mubr.msk.f32.vlgmr.msra.gmra.mrb[28].mxu1 %vm467_vm0, %v1608_v59  ;;  %4194 = vmatprep.subr.bf16.mxu0 %v4193_v58  ;;  %v4289_v57 = vpack.c.bf16 %v1718_v56, %v1717_v55  ;;  %v1720_v59 = vld [vmem:[#allocation14 + $0x158] sm:$0xff]  ;;  %v1947_v55 = vld [vmem:[#allocation22 + $0x70] sm:$0xff]  ;;  %v1948_v56 = vld [vmem:[#allocation22 + $0x78] sm:$0xff] }
 0x4aa   :  { %3712 = vmatprep.mubr.msk.f32.mxu1 %vm467_vm0, %v1609_v62  ;;  %v1722_v62 = vld [vmem:[#allocation14 + $0x168] sm:$0xff] }
 0x4ac   :  { %4196 = vmatpush3.bf16.msra.mxu0 %v4193_v58  ;;  %v1719_v58 = vld [vmem:[#allocation14 + $0x150] sm:$0xff] }
 0x4ad   :  { %3713 = vmatmul.mubr.msk.f32.gmra.mrb[30].mxu1 %vm467_vm0, %v1610_v0  ;;  %4198 = vmatprep.subr.bf16.mxu0 %v4197_v63  ;;  %v4293_v60 = vpack.c.bf16 %v1720_v59, %v1719_v58  ;;  %v1723_v0 = vld [vmem:[#allocation14 + $0x170] sm:$0xff]  ;;  %v2211_v58 = vld [vmem:[#allocation20 + $0x20] sm:$0xff] }
 0x4ae   :  { %v4301_v2 = vpack.c.bf16 %v1724_v1, %v1723_v0  ;;  %v2212_v59 = vld [vmem:[#allocation20 + $0x28] sm:$0xff]  ;;  %v2118_v0 = vld [vmem:[#allocation22 + $0x88] sm:$0xff] }
 0x4b0   :  { %4200 = vmatpush3.bf16.msra.mxu0 %v4197_v63  ;;  %v4297_v63 = vpack.c.bf16 %v1722_v62, %v1721_v61  ;;  %v2033_v62 = vld [vmem:[#allocation20 + $0x10] sm:$0xff] }
 0x4b1   :  { %4202 = vmatprep.subr.bf16.mxu0 %v4201_v3 }
 0x4b4   :  { %4204 = vmatpush3.bf16.msra.mxu0 %v4201_v3  ;;  %v1849_v3 = vld [vmem:[#allocation20] sm:$0xff] }
 0x4b5   :  { %4206 = vmatprep.subr.bf16.mxu0 %v4205_v6  ;;  %3761 = vmatprep.mubr.msk.f32.mxu1 %vm1851_vm9, %v1849_v3  ;;  %v2120_v3 = vld [vmem:[#allocation22 + $0x98] sm:$0xff] }
 0x4b8   :  { %4208 = vmatpush3.bf16.msra.mxu0 %v4205_v6 }
 0x4b9   :  { %4226 = vmatprep.subr.bf16.mxu0 %v4225_v9 }
 0x56c   :  { %v3591_v12 = vpop.f32.mrb[8].mxu0  ;;  %v3651_v13 = vpop.f32.mrb[24].mxu1 }
 0x56d   :  { %v1268_v14 = vpop.f32.mrb[9].mxu0  ;;  %v1481_v16 = vpop.f32.mrb[25].mxu1 }
 0x56e   :  { %3627 = vmatprep.mubr.f32.mxu0 %v1268_v14  ;;  %v2993_v14 = vld [vmem:[#allocation19] ss:$0 sm:$0xff] }
 0x56f   :  { %3628 = vmatmul.mubr.f32.vlgmr.msra.gmra.mrb[12].mxu0 %v3591_v12 }
 0x570   :  { %4228 = vmatpush3.bf16.msra.mxu0 %v4225_v9  ;;  %v3594_v19 = vpop.f32.mrb[10].mxu0  ;;  %v3654_v20 = vpop.f32.mrb[26].mxu1 }
 0x571   :  { %4230 = vmatprep.subr.bf16.mxu0 %v4229_v15  ;;  %v1278_v22 = vpop.f32.mrb[11].mxu0  ;;  %v1491_v23 = vpop.f32.mrb[27].mxu1 }
 0x572   :  { %3630 = vmatprep.mubr.f32.mxu0 %v1278_v22 }
 0x573   :  { %3631 = vmatmul.mubr.f32.gmra.mrb[14].mxu0 %v3594_v19 }
 0x574   :  { %4232 = vmatpush3.bf16.msra.mxu0 %v4229_v15  ;;  %3687 = vmatprep.mubr.f32.mxu0 %v1481_v16 }
 0x575   :  { %4234 = vmatprep.subr.bf16.mxu0 %v4233_v21 }
 0x578   :  { %4236 = vmatpush3.bf16.msra.mxu0 %v4233_v21 }
 0x579   :  { %4238 = vmatprep.subr.bf16.mxu0 %v4237_v26 }
 0x57c   :  { %4240 = vmatpush3.bf16.msra.mxu0 %v4237_v26  ;;  %v3711_v32 = vpop.f32.mrb[28].mxu1 }
 0x57d   :  { %4242 = vmatprep.subr.bf16.mxu0 %v4241_v29  ;;  %v1689_v34 = vpop.f32.mrb[29].mxu1 }
 0x580   :  { %4244 = vmatpush3.bf16.msra.mxu0 %v4241_v29  ;;  %v3714_v37 = vpop.f32.mrb[30].mxu1 }
 0x581   :  { %4246 = vmatprep.subr.bf16.mxu0 %v4245_v33  ;;  %v1699_v39 = vpop.f32.mrb[31].mxu1 }
 0x584   :  { %4248 = vmatpush3.bf16.msra.mxu0 %v4245_v33 }
 0x585   :  { %4250 = vmatprep.subr.bf16.mxu0 %v4249_v38 }
 0x588   :  { %4252 = vmatpush3.bf16.msra.mxu0 %v4249_v38  ;;  %v1850_v38 = vld [vmem:[#allocation20 + $0x8] sm:$0xff] }
 0x589   :  { %4254 = vmatprep.subr.bf16.mxu0 %v4253_v42 }
 0x58c   :  { %4256 = vmatpush3.bf16.msra.mxu0 %v4253_v42  ;;  %v4321_v42 = vpack.c.bf16 %v1938_v41, %v1937_v40  ;;  %v2303_v40 = vld [vmem:[#allocation22 + $0x140] sm:$0xff]  ;;  %v2304_v41 = vld [vmem:[#allocation22 + $0x148] sm:$0xff] }
 0x58d   :  { %4274 = vmatprep.subr.bf16.mxu0 %v4273_v45 }
 0x58f   :  { %3688 = vmatmul.mubr.f32.vlgmr.msra.gmra.mrb[12].mxu0 %v3651_v13 }
 0x590   :  { %4276 = vmatpush3.bf16.msra.mxu0 %v4273_v45  ;;  %3690 = vmatprep.mubr.f32.mxu0 %v1491_v23  ;;  %v4325_v45 = vpack.c.bf16 %v1940_v44, %v1939_v43  ;;  %v2305_v43 = vld [vmem:[#allocation22 + $0x150] sm:$0xff]  ;;  %v2306_v44 = vld [vmem:[#allocation22 + $0x158] sm:$0xff] }
 0x591   :  { %4278 = vmatprep.subr.bf16.mxu0 %v4277_v48 }
 0x593   :  { %3691 = vmatmul.mubr.f32.gmra.mrb[14].mxu0 %v3654_v20 }
 0x594   :  { %4280 = vmatpush3.bf16.msra.mxu0 %v4277_v48  ;;  %3747 = vmatprep.mubr.f32.mxu0 %v1689_v34  ;;  %v4329_v48 = vpack.c.bf16 %v1942_v47, %v1941_v46  ;;  %v2307_v46 = vld [vmem:[#allocation22 + $0x160] sm:$0xff]  ;;  %v2308_v47 = vld [vmem:[#allocation22 + $0x168] sm:$0xff] }
 0x595   :  { %4282 = vmatprep.subr.bf16.mxu0 %v4281_v51 }
 0x598   :  { %4284 = vmatpush3.bf16.msra.mxu0 %v4281_v51  ;;  %v4333_v51 = vpack.c.bf16 %v1944_v50, %v1943_v49  ;;  %v2309_v49 = vld [vmem:[#allocation22 + $0x170] sm:$0xff]  ;;  %v2310_v50 = vld [vmem:[#allocation22 + $0x178] sm:$0xff] }
 0x599   :  { %4286 = vmatprep.subr.bf16.mxu0 %v4285_v54 }
 0x59c   :  { %4288 = vmatpush3.bf16.msra.mxu0 %v4285_v54  ;;  %v4337_v54 = vpack.c.bf16 %v1946_v53, %v1945_v52  ;;  %v5111_v52 = vmov 0.0|0.0   ;;  %v5113_v53 = vmov 0.0  }
 0x59d   :  { %4290 = vmatprep.subr.bf16.mxu0 %v4289_v57 }
 0x5a0   :  { %4292 = vmatpush3.bf16.msra.mxu0 %v4289_v57  ;;  %v4341_v57 = vpack.c.bf16 %v1948_v56, %v1947_v55 }
 0x5a1   :  { %4294 = vmatprep.subr.bf16.mxu0 %v4293_v60 }
 0x5a4   :  { %4296 = vmatpush3.bf16.msra.mxu0 %v4293_v60 }
 0x5a5   :  { %4298 = vmatprep.subr.bf16.mxu0 %v4297_v63 }
 0x5a8   :  { %4300 = vmatpush3.bf16.msra.mxu0 %v4297_v63  ;;  %v2117_v63 = vld [vmem:[#allocation22 + $0x80] sm:$0xff] }
 0x5a9   :  { %4302 = vmatprep.subr.bf16.mxu0 %v4301_v2  ;;  %v4353_v1 = vpack.c.bf16 %v2118_v0, %v2117_v63  ;;  %v3002_v63 = vld [vmem:[#allocation26] ss:$0 sm:$0xff] }
 0x5ac   :  { %4304 = vmatpush3.bf16.msra.mxu0 %v4301_v2  ;;  %v2119_v2 = vld [vmem:[#allocation22 + $0x90] sm:$0xff] }
 0x5af   :  { %3748 = vmatmul.mubr.f32.vlgmr.msra.gmra.mrb[12].mxu0 %v3711_v32  ;;  %v1934_v32 = vld [vmem:[#allocation22 + $0x8] sm:$0xff] }
 0x5b0   :  { %3750 = vmatprep.mubr.f32.mxu0 %v1699_v39  ;;  %v4313_v35 = vpack.c.bf16 %v1934_v32, %v1933_v31 }
 0x5b3   :  { %3751 = vmatmul.mubr.f32.gmra.mrb[14].mxu0 %v3714_v37  ;;  %v1936_v37 = vld [vmem:[#allocation22 + $0x18] sm:$0xff] }
 0x5b4   :  { %v4317_v39 = vpack.c.bf16 %v1936_v37, %v1935_v36  ;;  %3853 = vmatprep.mubr.msk.f32.mxu0 %vm1851_vm9, %v2211_v58  ;;  %v2301_v37 = vld [vmem:[#allocation22 + $0x130] sm:$0xff] }
 0x682   :  { %v3749_v5 = vpop.f32.mrb[12].mxu0 }
 0x683   :  { %v4514_v6 = vadd.f32 %v3749_v5, %v2983_v4  ;;  %v1791_v7 = vpop.f32.mrb[13].mxu0  ;;  %v4357_v5 = vpack.c.bf16 %v2120_v3, %v2119_v2 }
 0x684   :  { %v4515_v8 = vadd.f32 %v2983_v4, %v1791_v7  ;;  %v2122_v7 = vld [vmem:[#allocation22 + $0xa8] sm:$0xff] }
 0x685   :  { %vm1815_vm10 = vcmp.gt.f32.partialorder %v4514_v6, 0.0  ;;  %v1819_v9 = vmul.f32 0.2, %v4514_v6 }
 0x686   :  { %vm1814_vm11 = vcmp.gt.f32.partialorder %v4515_v8, 0.0  ;;  %v1818_v11 = vmul.f32 0.2, %v4515_v8  ;;  %v3752_v12 = vpop.f32.mrb[14].mxu0 }
 0x687   :  { %v1823_v13 = vsel %vm1815_vm10, %v4514_v6, %v1819_v9  ;;  %v4516_v15 = vadd.f32 %v3752_v12, %v2983_v4  ;;  %v1801_v16 = vpop.f32.mrb[15].mxu0  ;;  %v2121_v6 = vld [vmem:[#allocation22 + $0xa0] sm:$0xff]  ;;  %v2123_v9 = vld [vmem:[#allocation22 + $0xb0] sm:$0xff] }
 0x688   :  { %v1834_v17 = vmul.f32 %v2992_v10, %v1823_v13  ;;  %v1822_v18 = vsel %vm1814_vm11, %v4515_v8, %v1818_v11  ;;  %v4517_v19 = vadd.f32 %v2983_v4, %v1801_v16  ;;  %v2034_v4 = vld [vmem:[#allocation20 + $0x18] sm:$0xff]  ;;  %v4361_v8 = vpack.c.bf16 %v2122_v7, %v2121_v6  ;;  %v2125_v12 = vld [vmem:[#allocation22 + $0xc0] sm:$0xff]  ;;  %v2128_v16 = vld [vmem:[#allocation22 + $0xd8] sm:$0xff] }
 0x689   :  { %v1833_v20 = vmul.f32 %v2992_v10, %v1822_v18  ;;  %vm1817_vm12 = vcmp.gt.f32.partialorder %v4516_v15, 0.0  ;;  %v1821_v21 = vmul.f32 0.2, %v4516_v15  ;;  %v2126_v13 = vld [vmem:[#allocation22 + $0xc8] sm:$0xff]  ;;  %v2129_v18 = vld [vmem:[#allocation22 + $0xe0] sm:$0xff] }
 0x68a   :  { %v1845_v22 = vadd.f32 %v2993_v14, %v1834_v17  ;;  %vm1816_vm13 = vcmp.gt.f32.partialorder %v4517_v19, 0.0  ;;  %v1820_v23 = vmul.f32 0.2, %v4517_v19  ;;  %v2489_v6 = vld [vmem:[#allocation29 + $0x8] sm:$0xff] }
 0x68b   :  { %v1844_v24 = vadd.f32 %v2993_v14, %v1833_v20  ;;  %v1825_v25 = vsel %vm1817_vm12, %v4516_v15, %v1821_v21  ;;  %v2127_v15 = vld [vmem:[#allocation22 + $0xd0] sm:$0xff] }
 0x68c   :  { %v1836_v26 = vmul.f32 %v2992_v10, %v1825_v25  ;;  %v1824_v27 = vsel %vm1816_vm13, %v4517_v19, %v1820_v23  ;;  %v4373_v17 = vpack.c.bf16 %v2128_v16, %v2127_v15  ;;  %v2130_v19 = vld [vmem:[#allocation22 + $0xe8] sm:$0xff]  ;;  %v2131_v21 = vld [vmem:[#allocation22 + $0xf0] sm:$0xff] }
 0x68d   :  { %v5641_v28 = vpack.c.bf16 %v1845_v22, %v1844_v24  ;;  %v1835_v29 = vmul.f32 %v2992_v10, %v1824_v27  ;;  %v2124_v10 = vld [vmem:[#allocation22 + $0xb8] sm:$0xff]  ;;  %v4377_v20 = vpack.c.bf16 %v2130_v19, %v2129_v18  ;;  %v2295_v24 = vld [vmem:[#allocation22 + $0x100] sm:$0xff]  ;;  %v2296_v25 = vld [vmem:[#allocation22 + $0x108] sm:$0xff] }
 0x68e   :  { %v1847_v30 = vadd.f32 %v2993_v14, %v1836_v26  ;;  %v4365_v11 = vpack.c.bf16 %v2124_v10, %v2123_v9  ;;  %v2132_v22 = vld [vmem:[#allocation22 + $0xf8] sm:$0xff]  ;;  %v4393_v26 = vpack.c.bf16 %v2296_v25, %v2295_v24  ;;  %v2490_v10 = vld [vmem:[#allocation29 + $0x10] sm:$0xff] }
 0x68f   :  { %v1846_v33 = vadd.f32 %v2993_v14, %v1835_v29  ;;  %4306 = vmatprep.subr.bf16.mxu1 %v5641_v28  ;;  %4386 = vmatprep.subr.bf16.mxu0 %v5641_v28  ;;  %v4369_v14 = vpack.c.bf16 %v2126_v13, %v2125_v12  ;;  %v4381_v23 = vpack.c.bf16 %v2132_v22, %v2131_v21  ;;  %v2297_v29 = vld [vmem:[#allocation22 + $0x110] sm:$0xff]  ;;  %v2492_v13 = vld [vmem:[#allocation29 + $0x20] sm:$0xff] }
 0x690   :  { %4308 = vmatpush3.bf16.msra.mxu1 %v5641_v28  ;;  %4388 = vmatpush3.bf16.msra.mxu0 %v5641_v28  ;;  %v2494_v16 = vld [vmem:[#allocation29 + $0x30] sm:$0xff]  ;;  %v2496_v19 = vld [vmem:[#allocation29 + $0x40] sm:$0xff] }
 0x691   :  { %v4309_v34 = vpack.c.bf16 %v1847_v30, %v1846_v33  ;;  %v2298_v30 = vld [vmem:[#allocation22 + $0x118] sm:$0xff]  ;;  %v2498_v22 = vld [vmem:[#allocation29 + $0x50] sm:$0xff] }
 0x692   :  { %v4397_v33 = vpack.c.bf16 %v2298_v30, %v2297_v29  ;;  %v2500_v25 = vld [vmem:[#allocation29 + $0x60] sm:$0xff]  ;;  %v2503_v29 = vld [vmem:[#allocation29 + $0x78] sm:$0xff] }
 0x693   :  { %4310 = vmatprep.subr.bf16.mxu1 %v4309_v34  ;;  %4390 = vmatprep.subr.bf16.mxu0 %v4309_v34 }
 0x694   :  { %4312 = vmatpush3.bf16.msra.mxu1 %v4309_v34  ;;  %4392 = vmatpush3.bf16.msra.mxu0 %v4309_v34 }
 0x695   :  { %4314 = vmatprep.subr.bf16.mxu1 %v4313_v35  ;;  %4425 = vmatprep.subr.bf16.mxu0 %v5111_v52 }
 0x697   :  { %3762 = vmatmul.mubr.msk.f32.vlgmr.msra.gmra.mrb[32].mxu1 %vm1851_vm9, %v1850_v38  ;;  %3854 = vmatmul.mubr.msk.f32.vlgmr.msra.gmra.mrb[16].mxu0 %vm1851_vm9, %v2212_v59  ;;  %v2302_v38 = vld [vmem:[#allocation22 + $0x138] sm:$0xff] }
 0x698   :  { %4316 = vmatpush3.bf16.msra.mxu1 %v4313_v35  ;;  %v2300_v35 = vld [vmem:[#allocation22 + $0x128] sm:$0xff]  ;;  %3895 = vmatprep.mubr.msk.f32.mxu0 %vm5112_vm14, %v5113_v53 }
 0x699   :  { %4318 = vmatprep.subr.bf16.mxu1 %v4317_v39 }
 0x69c   :  { %4320 = vmatpush3.bf16.msra.mxu1 %v4317_v39  ;;  %v4405_v39 = vpack.c.bf16 %v2302_v38, %v2301_v37  ;;  %v2659_v38 = vld [vmem:[#allocation29 + $0x90] sm:$0xff] }
 0x69d   :  { %4322 = vmatprep.subr.bf16.mxu1 %v4321_v42 }
 0x6a0   :  { %4324 = vmatpush3.bf16.msra.mxu1 %v4321_v42  ;;  %v4409_v42 = vpack.c.bf16 %v2304_v41, %v2303_v40  ;;  %v2661_v41 = vld [vmem:[#allocation29 + $0xa0] sm:$0xff] }
 0x6a1   :  { %4326 = vmatprep.subr.bf16.mxu1 %v4325_v45 }
 0x6a4   :  { %4328 = vmatpush3.bf16.msra.mxu1 %v4325_v45  ;;  %v4413_v45 = vpack.c.bf16 %v2306_v44, %v2305_v43  ;;  %v2663_v44 = vld [vmem:[#allocation29 + $0xb0] sm:$0xff] }
 0x6a5   :  { %4330 = vmatprep.subr.bf16.mxu1 %v4329_v48 }
 0x6a8   :  { %4332 = vmatpush3.bf16.msra.mxu1 %v4329_v48  ;;  %v4417_v48 = vpack.c.bf16 %v2308_v47, %v2307_v46  ;;  %v2665_v47 = vld [vmem:[#allocation29 + $0xc0] sm:$0xff] }
 0x6a9   :  { %4334 = vmatprep.subr.bf16.mxu1 %v4333_v51 }
 0x6ac   :  { %4336 = vmatpush3.bf16.msra.mxu1 %v4333_v51  ;;  %v4421_v51 = vpack.c.bf16 %v2310_v50, %v2309_v49  ;;  %v2667_v50 = vld [vmem:[#allocation29 + $0xd0] sm:$0xff] }
 0x6ad   :  { %4338 = vmatprep.subr.bf16.mxu1 %v4337_v54 }
 0x6b0   :  { %4340 = vmatpush3.bf16.msra.mxu1 %v4337_v54  ;;  %v2996_v54 = vld [vmem:[#allocation23] ss:$0 sm:$0xff] }
 0x6b1   :  { %4342 = vmatprep.subr.bf16.mxu1 %v4341_v57 }
 0x6b4   :  { %4344 = vmatpush3.bf16.msra.mxu1 %v4341_v57 }
 0x6b5   :  { %4346 = vmatprep.subr.bf16.mxu1 %v5641_v28 }
 0x76a   :  { %v3763_v60 = vpop.f32.mrb[32].mxu1  ;;  %v3855_v27 = vpop.f32.mrb[16].mxu0 }
 0x76b   :  { %v1924_v61 = vpop.f32.mrb[33].mxu1 }
 0x76c   :  { %3796 = vmatprep.mubr.f32.mxu1 %v1924_v61 }
 0x76d   :  { %3797 = vmatmul.mubr.f32.vlgmr.msra.gmra.mrb[34].mxu1 %v3763_v60  ;;  %v3001_v60 = vld [vmem:[#allocation25] ss:$0 sm:$0xff] }
 0x76e   :  { %4348 = vmatpush3.bf16.msra.mxu1 %v5641_v28  ;;  %3807 = vmatprep.mubr.msk.f32.mxu1 %vm1851_vm9, %v2033_v62  ;;  %v2285_v28 = vpop.f32.mrb[17].mxu0 }
 0x76f   :  { %4350 = vmatprep.subr.bf16.mxu1 %v4309_v34 }
 0x772   :  { %4352 = vmatpush3.bf16.msra.mxu1 %v4309_v34  ;;  %v2299_v34 = vld [vmem:[#allocation22 + $0x120] sm:$0xff] }
 0x773   :  { %4354 = vmatprep.subr.bf16.mxu1 %v4353_v1  ;;  %v4401_v36 = vpack.c.bf16 %v2300_v35, %v2299_v34 }
 0x775   :  { %3808 = vmatmul.mubr.msk.f32.vlgmr.msra.gmra.mrb[36].mxu1 %vm1851_vm9, %v2034_v4 }
 0x776   :  { %4356 = vmatpush3.bf16.msra.mxu1 %v4353_v1 }
 0x777   :  { %4358 = vmatprep.subr.bf16.mxu1 %v4357_v5 }
 0x77a   :  { %4360 = vmatpush3.bf16.msra.mxu1 %v4357_v5  ;;  %v2488_v5 = vld [vmem:[#allocation29] sm:$0xff] }
 0x77b   :  { %4362 = vmatprep.subr.bf16.mxu1 %v4361_v8  ;;  %v4429_v9 = vpack.c.bf16 %v2489_v6, %v2488_v5 }
 0x77e   :  { %4364 = vmatpush3.bf16.msra.mxu1 %v4361_v8  ;;  %v2413_v8 = vld [vmem:[#allocation28] sm:$0xff] }
 0x77f   :  { %4366 = vmatprep.subr.bf16.mxu1 %v4365_v11 }
 0x782   :  { %4368 = vmatpush3.bf16.msra.mxu1 %v4365_v11  ;;  %v2491_v11 = vld [vmem:[#allocation29 + $0x18] sm:$0xff] }
 0x783   :  { %4370 = vmatprep.subr.bf16.mxu1 %v4369_v14  ;;  %v4432_v12 = vpack.c.bf16 %v2491_v11, %v2490_v10  ;;  %v2826_v10 = vld [vmem:[#allocation29 + $0x130] sm:$0xff]  ;;  %v2827_v11 = vld [vmem:[#allocation29 + $0x138] sm:$0xff] }
 0x786   :  { %4372 = vmatpush3.bf16.msra.mxu1 %v4369_v14  ;;  %v2493_v14 = vld [vmem:[#allocation29 + $0x28] sm:$0xff] }
 0x787   :  { %4374 = vmatprep.subr.bf16.mxu1 %v4373_v17  ;;  %v4435_v15 = vpack.c.bf16 %v2493_v14, %v2492_v13  ;;  %v2828_v13 = vld [vmem:[#allocation29 + $0x140] sm:$0xff]  ;;  %v2829_v14 = vld [vmem:[#allocation29 + $0x148] sm:$0xff] }
 0x78a   :  { %4376 = vmatpush3.bf16.msra.mxu1 %v4373_v17  ;;  %v2495_v17 = vld [vmem:[#allocation29 + $0x38] sm:$0xff] }
 0x78b   :  { %4378 = vmatprep.subr.bf16.mxu1 %v4377_v20  ;;  %v4438_v18 = vpack.c.bf16 %v2495_v17, %v2494_v16  ;;  %v2831_v16 = vld [vmem:[#allocation29 + $0x158] sm:$0xff] }
 0x78e   :  { %4380 = vmatpush3.bf16.msra.mxu1 %v4377_v20  ;;  %v2497_v20 = vld [vmem:[#allocation29 + $0x48] sm:$0xff] }
 0x78f   :  { %4382 = vmatprep.subr.bf16.mxu1 %v4381_v23  ;;  %v4441_v21 = vpack.c.bf16 %v2497_v20, %v2496_v19  ;;  %v2833_v19 = vld [vmem:[#allocation29 + $0x168] sm:$0xff] }
 0x792   :  { %4384 = vmatpush3.bf16.msra.mxu1 %v4381_v23  ;;  %v2499_v23 = vld [vmem:[#allocation29 + $0x58] sm:$0xff] }
 0x793   :  { %4394 = vmatprep.subr.bf16.mxu1 %v4393_v26  ;;  %v4444_v24 = vpack.c.bf16 %v2499_v23, %v2498_v22  ;;  %v2835_v22 = vld [vmem:[#allocation29 + $0x178] sm:$0xff] }
 0x848   :  { %v3809_v31 = vpop.f32.mrb[36].mxu1 }
 0x849   :  { %v2107_v32 = vpop.f32.mrb[37].mxu1 }
 0x84a   :  { %3842 = vmatprep.mubr.f32.mxu1 %v2107_v32  ;;  %v2657_v32 = vld [vmem:[#allocation29 + $0x80] sm:$0xff] }
 0x84b   :  { %3843 = vmatmul.mubr.f32.vlgmr.msra.gmra.mrb[34].mxu1 %v3809_v31  ;;  %v2745_v31 = vld [vmem:[#allocation28 + $0x10] sm:$0xff] }
 0x84c   :  { %4396 = vmatpush3.bf16.msra.mxu1 %v4393_v26  ;;  %3888 = vmatprep.mubr.f32.mxu1 %v2285_v28  ;;  %v2501_v26 = vld [vmem:[#allocation29 + $0x68] sm:$0xff]  ;;  %v2502_v28 = vld [vmem:[#allocation29 + $0x70] sm:$0xff] }
 0x84d   :  { %4398 = vmatprep.subr.bf16.mxu1 %v4397_v33  ;;  %v4450_v30 = vpack.c.bf16 %v2503_v29, %v2502_v28  ;;  %v3007_v29 = vld [vmem:[#allocation32] ss:$0 sm:$0xff] }
 0x850   :  { %4400 = vmatpush3.bf16.msra.mxu1 %v4397_v33  ;;  %v2658_v33 = vld [vmem:[#allocation29 + $0x88] sm:$0xff] }
 0x851   :  { %4402 = vmatprep.subr.bf16.mxu1 %v4401_v36  ;;  %v4456_v37 = vpack.c.bf16 %v2658_v33, %v2657_v32 }
 0x854   :  { %4404 = vmatpush3.bf16.msra.mxu1 %v4401_v36  ;;  %v2582_v36 = vld [vmem:[#allocation28 + $0x8] sm:$0xff] }
 0x855   :  { %4406 = vmatprep.subr.bf16.mxu1 %v4405_v39 }
 0x858   :  { %4408 = vmatpush3.bf16.msra.mxu1 %v4405_v39  ;;  %v2660_v39 = vld [vmem:[#allocation29 + $0x98] sm:$0xff] }
 0x859   :  { %4410 = vmatprep.subr.bf16.mxu1 %v4409_v42  ;;  %v4459_v40 = vpack.c.bf16 %v2660_v39, %v2659_v38 }
 0x85c   :  { %4412 = vmatpush3.bf16.msra.mxu1 %v4409_v42  ;;  %v2662_v42 = vld [vmem:[#allocation29 + $0xa8] sm:$0xff] }
 0x85d   :  { %4414 = vmatprep.subr.bf16.mxu1 %v4413_v45  ;;  %v4462_v43 = vpack.c.bf16 %v2662_v42, %v2661_v41 }
 0x860   :  { %4416 = vmatpush3.bf16.msra.mxu1 %v4413_v45  ;;  %v2664_v45 = vld [vmem:[#allocation29 + $0xb8] sm:$0xff] }
 0x861   :  { %4418 = vmatprep.subr.bf16.mxu1 %v4417_v48  ;;  %v4465_v46 = vpack.c.bf16 %v2664_v45, %v2663_v44 }
 0x864   :  { %4420 = vmatpush3.bf16.msra.mxu1 %v4417_v48  ;;  %v2666_v48 = vld [vmem:[#allocation29 + $0xc8] sm:$0xff] }
 0x865   :  { %4422 = vmatprep.subr.bf16.mxu1 %v4421_v51  ;;  %v4468_v49 = vpack.c.bf16 %v2666_v48, %v2665_v47 }
 0x868   :  { %4424 = vmatpush3.bf16.msra.mxu1 %v4421_v51  ;;  %v2668_v51 = vld [vmem:[#allocation29 + $0xd8] sm:$0xff] }
 0x869   :  { %4479 = vmatprep.subr.bf16.mxu1 %v5111_v52 }
 0x86b   :  { %3889 = vmatmul.mubr.f32.vlgmr.msra.gmra.mrb[34].mxu1 %v3855_v27  ;;  %v4447_v27 = vpack.c.bf16 %v2501_v26, %v2500_v25 }
 0x86c   :  { %3979 = vmatprep.mubr.msk.f32.mxu1 %vm5112_vm14, %v5113_v53 }
 0x93e   :  { %v3890_v55 = vpop.f32.mrb[34].mxu1 }
 0x93f   :  { %v4518_v56 = vadd.f32 %v3890_v55, %v2996_v54  ;;  %v2377_v57 = vpop.f32.mrb[35].mxu1  ;;  %v2669_v55 = vld [vmem:[#allocation29 + $0xe0] sm:$0xff] }
 0x940   :  { %v4519_v58 = vadd.f32 %v2996_v54, %v2377_v57  ;;  %v4471_v54 = vpack.c.bf16 %v2668_v51, %v2667_v50 }
 0x941   :  { %vm2389_vm15 = vcmp.gt.f32.partialorder %v4518_v56, 0.0  ;;  %v2391_v59 = vmul.f32 0.2, %v4518_v56 }
 0x942   :  { %vm2388_vm0 = vcmp.gt.f32.partialorder %v4519_v58, 0.0  ;;  %v2390_v61 = vmul.f32 0.2, %v4519_v58 }
 0x943   :  { %v2393_v62 = vsel %vm2389_vm15, %v4518_v56, %v2391_v59  ;;  %v2670_v56 = vld [vmem:[#allocation29 + $0xe8] sm:$0xff]  ;;  %v2672_v59 = vld [vmem:[#allocation29 + $0xf8] sm:$0xff] }
 0x944   :  { %v2402_v0 = vmul.f32 %v3001_v60, %v2393_v62  ;;  %v2392_v1 = vsel %vm2388_vm0, %v4519_v58, %v2390_v61  ;;  %v4474_v57 = vpack.c.bf16 %v2670_v56, %v2669_v55  ;;  %v2671_v58 = vld [vmem:[#allocation29 + $0xf0] sm:$0xff] }
 0x945   :  { %v2401_v2 = vmul.f32 %v3001_v60, %v2392_v1  ;;  %v4477_v60 = vpack.c.bf16 %v2672_v59, %v2671_v58 }
 0x946   :  { %v2411_v3 = vadd.f32 %v3002_v63, %v2402_v0  ;;  %v2821_v0 = vld [vmem:[#allocation29 + $0x108] sm:$0xff] }
 0x947   :  { %v2410_v4 = vadd.f32 %v3002_v63, %v2401_v2  ;;  %v2820_v63 = vld [vmem:[#allocation29 + $0x100] sm:$0xff]  ;;  %v2822_v2 = vld [vmem:[#allocation29 + $0x110] sm:$0xff] }
 0x948   :  { %v4483_v1 = vpack.c.bf16 %v2821_v0, %v2820_v63 }
 0x949   :  { %v4426_v7 = vpack.c.bf16 %v2411_v3, %v2410_v4  ;;  %v2823_v3 = vld [vmem:[#allocation29 + $0x118] sm:$0xff] }
 0x94a   :  { %v4486_v6 = vpack.c.bf16 %v2823_v3, %v2822_v2 }
 0x94b   :  { %4427 = vmatpush3.bf16.msra.mxu0 %v4426_v7  ;;  %4481 = vmatpush3.bf16.msra.mxu1 %v4426_v7 }
 0x94c   :  { %4428 = vmatprep.subr.bf16.mxu0 %v5111_v52 }
 0x94e   :  { %3896 = vmatmul.mubr.msk.f32.vlgmr.msra.gmra.mrb[18].mxu0 %vm2414_vm1, %v2413_v8  ;;  %3980 = vmatmul.mubr.msk.f32.vlgmr.msra.gmra.mrb[38].mxu1 %vm2414_vm1, %v2745_v31  ;;  %v2825_v8 = vld [vmem:[#allocation29 + $0x128] sm:$0xff]  ;;  %v3008_v31 = vld [vmem:[#allocation34] ss:$0 sm:$0xff] }
 0x94f   :  { %4430 = vmatpush3.bf16.msra.mxu0 %v4429_v9  ;;  %3930 = vmatprep.mubr.msk.f32.mxu0 %vm5112_vm14, %v5113_v53 }
 0x950   :  { %4431 = vmatprep.subr.bf16.mxu0 %v5111_v52 }
 0x953   :  { %4433 = vmatpush3.bf16.msra.mxu0 %v4432_v12  ;;  %v4492_v12 = vpack.c.bf16 %v2827_v11, %v2826_v10 }
 0x954   :  { %4434 = vmatprep.subr.bf16.mxu0 %v5111_v52 }
 0x957   :  { %4436 = vmatpush3.bf16.msra.mxu0 %v4435_v15  ;;  %v4495_v15 = vpack.c.bf16 %v2829_v14, %v2828_v13 }
 0x958   :  { %4437 = vmatprep.subr.bf16.mxu0 %v5111_v52 }
 0x95b   :  { %4439 = vmatpush3.bf16.msra.mxu0 %v4438_v18  ;;  %v2832_v18 = vld [vmem:[#allocation29 + $0x160] sm:$0xff] }
 0x95c   :  { %4440 = vmatprep.subr.bf16.mxu0 %v5111_v52  ;;  %v4501_v20 = vpack.c.bf16 %v2833_v19, %v2832_v18 }
 0x95f   :  { %4442 = vmatpush3.bf16.msra.mxu0 %v4441_v21  ;;  %v2834_v21 = vld [vmem:[#allocation29 + $0x170] sm:$0xff] }
 0x960   :  { %4443 = vmatprep.subr.bf16.mxu0 %v5111_v52  ;;  %v4504_v23 = vpack.c.bf16 %v2835_v22, %v2834_v21 }
 0x963   :  { %4445 = vmatpush3.bf16.msra.mxu0 %v4444_v24  ;;  %v3004_v24 = vld [vmem:[#allocation31] ss:$0 sm:$0xff] }
 0x964   :  { %4446 = vmatprep.subr.bf16.mxu0 %v5111_v52 }
 0x967   :  { %4448 = vmatpush3.bf16.msra.mxu0 %v4447_v27 }
 0x968   :  { %4449 = vmatprep.subr.bf16.mxu0 %v5111_v52 }
 0x96b   :  { %4451 = vmatpush3.bf16.msra.mxu0 %v4450_v30 }
 0x96c   :  { %4452 = vmatprep.subr.bf16.mxu0 %v5111_v52 }
 0xa21   :  { %v2484_v34 = vpop.f32.mrb[18].mxu0  ;;  %v2815_v61 = vpop.f32.mrb[38].mxu1 }
 0xa22   :  { %v3897_v35 = vpop.f32.mrb[19].mxu0  ;;  %3931 = vmatmul.mubr.f32.vlgmr.msra.gmra.mrb[20].mxu0 %v2484_v34  ;;  %v3981_v62 = vpop.f32.mrb[39].mxu1 }
 0xa23   :  { %4454 = vmatpush3.bf16.msra.mxu0 %v4426_v7  ;;  %3937 = vmatprep.mubr.msk.f32.mxu0 %vm5112_vm14, %v5113_v53  ;;  %v2824_v7 = vld [vmem:[#allocation29 + $0x120] sm:$0xff] }
 0xa24   :  { %4455 = vmatprep.subr.bf16.mxu0 %v5111_v52  ;;  %v4489_v9 = vpack.c.bf16 %v2825_v8, %v2824_v7 }
 0xa26   :  { %3938 = vmatmul.mubr.msk.f32.vlgmr.msra.gmra.mrb[22].mxu0 %vm2414_vm1, %v2582_v36 }
 0xa27   :  { %4457 = vmatpush3.bf16.msra.mxu0 %v4456_v37  ;;  %3972 = vmatprep.mubr.msk.f32.mxu0 %vm5112_vm14, %v5113_v53 }
 0xa28   :  { %4458 = vmatprep.subr.bf16.mxu0 %v5111_v52 }
 0xa2b   :  { %4460 = vmatpush3.bf16.msra.mxu0 %v4459_v40 }
 0xa2c   :  { %4461 = vmatprep.subr.bf16.mxu0 %v5111_v52 }
 0xa2f   :  { %4463 = vmatpush3.bf16.msra.mxu0 %v4462_v43 }
 0xa30   :  { %4464 = vmatprep.subr.bf16.mxu0 %v5111_v52 }
 0xa33   :  { %4466 = vmatpush3.bf16.msra.mxu0 %v4465_v46 }
 0xa34   :  { %4467 = vmatprep.subr.bf16.mxu0 %v5111_v52 }
 0xa37   :  { %4469 = vmatpush3.bf16.msra.mxu0 %v4468_v49 }
 0xa38   :  { %4470 = vmatprep.subr.bf16.mxu0 %v5111_v52 }
 0xa3b   :  { %4472 = vmatpush3.bf16.msra.mxu0 %v4471_v54 }
 0xa3c   :  { %4473 = vmatprep.subr.bf16.mxu0 %v5111_v52 }
 0xa3f   :  { %4475 = vmatpush3.bf16.msra.mxu0 %v4474_v57 }
 0xa40   :  { %4476 = vmatprep.subr.bf16.mxu0 %v5111_v52 }
 0xa43   :  { %4478 = vmatpush3.bf16.msra.mxu0 %v4477_v60 }
 0xa44   :  { %4482 = vmatprep.subr.bf16.mxu0 %v5111_v52 }
 0xaf9   :  { %v2652_v4 = vpop.f32.mrb[22].mxu0 }
 0xafa   :  { %v3939_v5 = vpop.f32.mrb[23].mxu0  ;;  %3973 = vmatmul.mubr.f32.vlgmr.msra.gmra.mrb[20].mxu0 %v2652_v4 }
 0xafb   :  { %4484 = vmatpush3.bf16.msra.mxu0 %v4483_v1  ;;  %4014 = vmatprep.mubr.msk.f32.mxu0 %vm5112_vm14, %v5113_v53  ;;  %v2830_v53 = vld [vmem:[#allocation29 + $0x150] sm:$0xff] }
 0xafc   :  { %4485 = vmatprep.subr.bf16.mxu0 %v5111_v52  ;;  %v4498_v17 = vpack.c.bf16 %v2831_v16, %v2830_v53 }
 0xaff   :  { %4487 = vmatpush3.bf16.msra.mxu0 %v4486_v6 }
 0xb00   :  { %4488 = vmatprep.subr.bf16.mxu0 %v5111_v52 }
 0xb03   :  { %4490 = vmatpush3.bf16.msra.mxu0 %v4489_v9 }
 0xb04   :  { %4491 = vmatprep.subr.bf16.mxu0 %v5111_v52 }
 0xb07   :  { %4493 = vmatpush3.bf16.msra.mxu0 %v4492_v12 }
 0xb08   :  { %4494 = vmatprep.subr.bf16.mxu0 %v5111_v52 }
 0xb0b   :  { %4496 = vmatpush3.bf16.msra.mxu0 %v4495_v15 }
 0xb0c   :  { %4497 = vmatprep.subr.bf16.mxu0 %v5111_v52 }
 0xb0f   :  { %4499 = vmatpush3.bf16.msra.mxu0 %v4498_v17 }
 0xb10   :  { %4500 = vmatprep.subr.bf16.mxu0 %v5111_v52 }
 0xb13   :  { %4502 = vmatpush3.bf16.msra.mxu0 %v4501_v20 }
 0xb14   :  { %4503 = vmatprep.subr.bf16.mxu0 %v5111_v52 }
 0xb17   :  { %4505 = vmatpush3.bf16.msra.mxu0 %v4504_v23 }
 0xb1a   :  { %4015 = vmatmul.mubr.f32.vlgmr.msra.gmra.mrb[20].mxu0 %v2815_v61 }
 0xbed   :  { %v2902_v25 = vpop.f32.mrb[20].mxu0 }
 0xbee   :  { %v4520_v26 = vadd.f32 %v3004_v24, %v2902_v25  ;;  %v4016_v27 = vpop.f32.mrb[21].mxu0 }
 0xbf0   :  { %vm2907_vm2 = vcmp.gt.f32.partialorder %v4520_v26, 0.0  ;;  %v2908_v28 = vmul.f32 0.2, %v4520_v26 }
 0xbf2   :  { %v2909_v30 = vsel %vm2907_vm2, %v4520_v26, %v2908_v28 }
 0xbf3   :  { %v2917_v32 = vmul.f32 %v3007_v29, %v2909_v30 }
 0xbf5   :  { %v2925_v33 = vadd.f32 %v3008_v31, %v2917_v32 }
 0xbf7   :  { %2926 = vst [vmem:[#allocation35] sm:$0xff] %v2925_v33 }
 0xbf8   :  { %5053 = shalt.err (!%p5050_p4)
}
 0xbf9   :  { %s5756_s24 = sld [smem:[#allocation54_spill]] }
 0xbff   :  { %s5054_s21 = scalar_lea.hbm %s5756_s24, 128 }
 0xc00   :  { %p5055_p5 = scmp.ne.s32.totalorder %s5756_s24, %s5054_s21  ;;  %p5058_p6 = scmp.lt.u32.totalorder %s5054_s21, %s5756_s24 }
 0xc02   :  { %p5060_p7 = pnand %p5058_p6, %p5055_p5 }
 0xc04   :  { %5063 = shalt.err (!%p5060_p7)
}
 0xc05   :  { %2936 = dma.vmem_to_hbm [thread:$0]  %s2934_s2, 128, %s5756_s24, [#allocation4]  }
 0xc06   :  { %5086 = dma.done.wait [#allocation4], 128  }
 0xc07   :  { %5087 = vsyncadd [#allocation4], 4294967168 }
 0xc08   :  { %2940 = vsyncpa [#allocation3], 1 }
 0xc09   :  { %2941 = vsyncpa [#allocation6], 1 }
 0xc0a   :  { %2942 = vsyncpa [#allocation9], 1 }
 0xc0b   :  { %2943 = vsyncpa [#allocation12], 1 }
 0xc0c   :  { %2944 = vsyncpa [#allocation15], 1 }
 0xc0d   :  { %2945 = vsyncpa [#allocation18], 1 }
 0xc0e   :  { %2946 = vsyncpa [#allocation21], 1 }
 0xc0f   :  { %2947 = vsyncpa [#allocation24], 1 }
 0xc10   :  { %2948 = vsyncpa [#allocation27], 1 }
 0xc11   :  { %2949 = vsyncpa [#allocation30], 1 }
 0xc12   :  { %2950 = vsyncpa [#allocation33], 1 }
 0xc13   :  { %2951 = vsyncpa [#allocation4], 1 }

</bundles_post_ra>
